<compile_context>
chip_gen: v7x
topology: tpu7x:2x2x1
jax: 0.10.0
libtpu: 0.0.40
codegen_flags: <defaults>
</compile_context>

<pallas_src>
import jax
import jax.numpy as jnp
from jax import lax
from jax.experimental import pallas as pl
from jax.experimental.pallas import tpu as pltpu

TOPK = 225  # TopKChannelPool2d(225)


def _make_newcse_kernel(C, HW, k):
    k_eff = min(k, HW)          # torch slice [..., -k:] takes all elements if HW < k
    m_bot = HW - k_eff          # number of smallest elements to discard

    def _extreme_sum(x, n, largest):
        """Sum of the n largest (largest=True) or n smallest values of each row of x (C, HW).

        Removes exactly one occurrence per step (index tie-break), so the result equals the
        sort-based top/bottom-n sum, up to fp summation order.
        """
        sign = jnp.float32(1.0) if largest else jnp.float32(-1.0)
        idx = lax.broadcasted_iota(jnp.int32, (C, HW), 1)

        def body(_, carry):
            xm, acc = carry                                         # (C, HW), (C, 1)
            cur = jnp.max(xm, axis=-1, keepdims=True)               # (C, 1)
            acc = acc + cur
            hit = xm == cur
            first = jnp.min(jnp.where(hit, idx, HW), axis=-1, keepdims=True)
            xm = jnp.where(idx == first, -jnp.inf, xm)              # knock out one occurrence
            return xm, acc

        init = (x * sign, jnp.zeros((C, 1), jnp.float32))
        _, acc = lax.fori_loop(0, n, body, init, unroll=True)
        return acc * sign

    def kernel(u_ref, wsqt_ref, wex_ref, o_ref):
        # u_ref:    VMEM (C, HW)      one batch element, lane-dense (HW on lanes)
        # wsqt_ref: VMEM (C, C//2)    Conv_Squeeze weight, transposed
        # wex_ref:  VMEM (C, C//2)    Conv_Excitation weight
        # o_ref:    VMEM (C, HW)
        x = u_ref[...]                                              # (C, HW) f32

        # ---- TopKChannelPool2d(k): mean of the k largest values per channel ----
        if k_eff == HW:
            pooled = jnp.sum(x, axis=-1, keepdims=True) * (1.0 / HW)
        elif k_eff <= m_bot:
            pooled = _extreme_sum(x, k_eff, largest=True) * (1.0 / k_eff)
        else:
            total = jnp.sum(x, axis=-1, keepdims=True)
            bot = _extreme_sum(x, m_bot, largest=False)
            pooled = (total - bot) * (1.0 / k_eff)                  # (C, 1)

        # ---- 1x1 squeeze / excitation convs (tiny channel-mixing mat-vecs) + sigmoid ----
        z1 = jnp.sum(wsqt_ref[...] * pooled, axis=0, keepdims=True)  # (1, C//2)
        z2 = jnp.sum(wex_ref[...] * z1, axis=1, keepdims=True)       # (C, 1)
        s = 1.0 / (1.0 + jnp.exp(-z2))                               # sigmoid, (C, 1)

        # ---- channel re-scale, fused (U never takes an extra HBM round trip) ----
        o_ref[...] = x * s

    return kernel


def newcse_forward(U, w_squeeze, w_excite, k=TOPK):
    """U: (N, C, H, W) f32; w_squeeze: (C//2, C, 1, 1); w_excite: (C, C//2, 1, 1)."""
    N, C, H, W = U.shape
    HW = H * W
    u2 = U.reshape(N, C, HW).astype(jnp.float32)                     # lane-dense view (free reshape)
    w_sq_t = w_squeeze.reshape(C // 2, C).T.astype(jnp.float32)      # (C, C//2)
    w_ex = w_excite.reshape(C, C // 2).astype(jnp.float32)           # (C, C//2)

    out = pl.pallas_call(
        _make_newcse_kernel(C, HW, k),
        grid=(N,),
        in_specs=[
            pl.BlockSpec((None, C, HW), lambda n: (n, 0, 0)),        # one batch element / step
            pl.BlockSpec((C, C // 2), lambda n: (0, 0)),             # squeeze weight (whole)
            pl.BlockSpec((C, C // 2), lambda n: (0, 0)),             # excitation weight (whole)
        ],
        out_specs=pl.BlockSpec((None, C, HW), lambda n: (n, 0, 0)),
        out_shape=jax.ShapeDtypeStruct((N, C, HW), jnp.float32),
        compiler_params=pltpu.CompilerParams(dimension_semantics=("parallel",)),
    )(u2, w_sq_t, w_ex)
    return out.reshape(N, C, H, W)


def newcse_reference(U, w_squeeze, w_excite, k=TOPK):
    """Pure-JAX reference of the PyTorch forward (for correctness check)."""
    N, C, H, W = U.shape
    k_eff = min(k, H * W)
    scores = U.reshape(N, C, -1)
    pooled = jnp.sort(scores, axis=2)[:, :, -k_eff:].mean(axis=2)    # (N, C)
    z1 = jnp.einsum("hc,nc->nh", w_squeeze.reshape(C // 2, C), pooled)
    z2 = jnp.einsum("ch,nh->nc", w_excite.reshape(C, C // 2), z1)
    s = jax.nn.sigmoid(z2)
    return U * s[:, :, None, None]


if __name__ == "__main__":
    key = jax.random.PRNGKey(0)
    ku, kw1, kw2 = jax.random.split(key, 3)

    N, C, H, W = 2, 4, 16, 16          # H*W = 256 >= 225, so the true top-k path is exercised
    U = jax.random.normal(ku, (N, C, H, W), dtype=jnp.float32)

    # PyTorch Conv2d default init: uniform(-1/sqrt(fan_in), 1/sqrt(fan_in)), fan_in = C_in * 1 * 1.
    b_sq = 1.0 / (C ** 0.5)
    w_squeeze = jax.random.uniform(kw1, (C // 2, C, 1, 1), jnp.float32, -b_sq, b_sq)
    b_ex = 1.0 / ((C // 2) ** 0.5)
    w_excite = jax.random.uniform(kw2, (C, C // 2, 1, 1), jnp.float32, -b_ex, b_ex)

    out = jax.block_until_ready(newcse_forward(U, w_squeeze, w_excite))
    ref = jax.block_until_ready(newcse_reference(U, w_squeeze, w_excite))

    assert out.shape == U.shape, out.shape
    max_err = float(jnp.max(jnp.abs(out - ref)))
    assert jnp.allclose(out, ref, atol=1e-5, rtol=1e-5), f"max abs err = {max_err}"
    print("KERNEL_OK")
</pallas_src>

<mosaic_0001>
module attributes {stable_mosaic.version = 11 : i64} {
  func.func @kernel(%arg0: i32, %arg1: memref<1x4x256xf32, #tpu.memory_space<vmem>>, %arg2: memref<4x2xf32, #tpu.memory_space<vmem>>, %arg3: memref<4x2xf32, #tpu.memory_space<vmem>>, %arg4: memref<1x4x256xf32, #tpu.memory_space<vmem>>) attributes {dimension_semantics = [#tpu.dimension_semantics<parallel>], iteration_bounds = array<i64: 2>, scalar_prefetch = 0 : i64, scratch_operands = 0 : i64, tpu.core_type = #tpu.core_type<tc>, window_params = [{transform_indices = @transform_0, window_bounds = array<i64: 1, 4, 256>}, {pipeline_mode = #tpu.pipeline_mode<synchronous>, transform_indices = @transform_1, window_bounds = array<i64: 4, 2>}, {pipeline_mode = #tpu.pipeline_mode<synchronous>, transform_indices = @transform_2, window_bounds = array<i64: 4, 2>}, {transform_indices = @transform_3, window_bounds = array<i64: 1, 4, 256>}]} {
    %c0 = arith.constant 0 : index
    %c0_0 = arith.constant 0 : index
    %c0_1 = arith.constant 0 : index
    %0 = vector.load %arg1[%c0, %c0_0, %c0_1] : memref<1x4x256xf32, #tpu.memory_space<vmem>>, vector<1x4x256xf32>
    %1 = vector.shape_cast %0 : vector<1x4x256xf32> to vector<4x256xf32>
    %cst = arith.constant dense<0.000000e+00> : vector<4xf32>
    %2 = vector.multi_reduction <add>, %1, %cst [1] : vector<4x256xf32> to vector<4xf32>
    %3 = vector.shape_cast %2 : vector<4xf32> to vector<4x1xf32>
    %4 = tpu.iota {dimensions = array<i32: 1>} : vector<4x256xi32>
    %cst_2 = arith.constant -1.000000e+00 : f32
    %5 = vector.broadcast %cst_2 : f32 to vector<4x256xf32>
    %6 = arith.mulf %1, %5 : vector<4x256xf32>
    %cst_3 = arith.constant 0.000000e+00 : f32
    %7 = vector.broadcast %cst_3 : f32 to vector<4x1xf32>
    %c0_i32 = arith.constant 0 : i32
    %cst_4 = arith.constant dense<0xFF800000> : vector<4xf32>
    %8 = vector.multi_reduction <maximumf>, %6, %cst_4 [1] : vector<4x256xf32> to vector<4xf32>
    %9 = vector.shape_cast %8 : vector<4xf32> to vector<4x1xf32>
    %10 = arith.addf %7, %9 : vector<4x1xf32>
    %11 = vector.broadcast %9 : vector<4x1xf32> to vector<4x256xf32>
    %12 = arith.cmpf oeq, %6, %11 : vector<4x256xf32>
    %c256_i32 = arith.constant 256 : i32
    %13 = vector.broadcast %c256_i32 : i32 to vector<4x256xi32>
    %14 = arith.select %12, %4, %13 : vector<4x256xi1>, vector<4x256xi32>
    %cst_5 = arith.constant dense<2147483647> : vector<4xi32>
    %15 = vector.multi_reduction <minsi>, %14, %cst_5 [1] : vector<4x256xi32> to vector<4xi32>
    %16 = vector.shape_cast %15 : vector<4xi32> to vector<4x1xi32>
    %17 = vector.broadcast %16 : vector<4x1xi32> to vector<4x256xi32>
    %18 = arith.cmpi eq, %4, %17 : vector<4x256xi32>
    %cst_6 = arith.constant 0xFF800000 : f32
    %19 = vector.broadcast %cst_6 : f32 to vector<4x256xf32>
    %20 = arith.select %18, %19, %6 : vector<4x256xi1>, vector<4x256xf32>
    %c1_i32 = arith.constant 1 : i32
    %cst_7 = arith.constant dense<0xFF800000> : vector<4xf32>
    %21 = vector.multi_reduction <maximumf>, %20, %cst_7 [1] : vector<4x256xf32> to vector<4xf32>
    %22 = vector.shape_cast %21 : vector<4xf32> to vector<4x1xf32>
    %23 = arith.addf %10, %22 : vector<4x1xf32>
    %24 = vector.broadcast %22 : vector<4x1xf32> to vector<4x256xf32>
    %25 = arith.cmpf oeq, %20, %24 : vector<4x256xf32>
    %c256_i32_8 = arith.constant 256 : i32
    %26 = vector.broadcast %c256_i32_8 : i32 to vector<4x256xi32>
    %27 = arith.select %25, %4, %26 : vector<4x256xi1>, vector<4x256xi32>
    %cst_9 = arith.constant dense<2147483647> : vector<4xi32>
    %28 = vector.multi_reduction <minsi>, %27, %cst_9 [1] : vector<4x256xi32> to vector<4xi32>
    %29 = vector.shape_cast %28 : vector<4xi32> to vector<4x1xi32>
    %30 = vector.broadcast %29 : vector<4x1xi32> to vector<4x256xi32>
    %31 = arith.cmpi eq, %4, %30 : vector<4x256xi32>
    %cst_10 = arith.constant 0xFF800000 : f32
    %32 = vector.broadcast %cst_10 : f32 to vector<4x256xf32>
    %33 = arith.select %31, %32, %20 : vector<4x256xi1>, vector<4x256xf32>
    %c2_i32 = arith.constant 2 : i32
    %cst_11 = arith.constant dense<0xFF800000> : vector<4xf32>
    %34 = vector.multi_reduction <maximumf>, %33, %cst_11 [1] : vector<4x256xf32> to vector<4xf32>
    %35 = vector.shape_cast %34 : vector<4xf32> to vector<4x1xf32>
    %36 = arith.addf %23, %35 : vector<4x1xf32>
    %37 = vector.broadcast %35 : vector<4x1xf32> to vector<4x256xf32>
    %38 = arith.cmpf oeq, %33, %37 : vector<4x256xf32>
    %c256_i32_12 = arith.constant 256 : i32
    %39 = vector.broadcast %c256_i32_12 : i32 to vector<4x256xi32>
    %40 = arith.select %38, %4, %39 : vector<4x256xi1>, vector<4x256xi32>
    %cst_13 = arith.constant dense<2147483647> : vector<4xi32>
    %41 = vector.multi_reduction <minsi>, %40, %cst_13 [1] : vector<4x256xi32> to vector<4xi32>
    %42 = vector.shape_cast %41 : vector<4xi32> to vector<4x1xi32>
    %43 = vector.broadcast %42 : vector<4x1xi32> to vector<4x256xi32>
    %44 = arith.cmpi eq, %4, %43 : vector<4x256xi32>
    %cst_14 = arith.constant 0xFF800000 : f32
    %45 = vector.broadcast %cst_14 : f32 to vector<4x256xf32>
    %46 = arith.select %44, %45, %33 : vector<4x256xi1>, vector<4x256xf32>
    %c3_i32 = arith.constant 3 : i32
    %cst_15 = arith.constant dense<0xFF800000> : vector<4xf32>
    %47 = vector.multi_reduction <maximumf>, %46, %cst_15 [1] : vector<4x256xf32> to vector<4xf32>
    %48 = vector.shape_cast %47 : vector<4xf32> to vector<4x1xf32>
    %49 = arith.addf %36, %48 : vector<4x1xf32>
    %50 = vector.broadcast %48 : vector<4x1xf32> to vector<4x256xf32>
    %51 = arith.cmpf oeq, %46, %50 : vector<4x256xf32>
    %c256_i32_16 = arith.constant 256 : i32
    %52 = vector.broadcast %c256_i32_16 : i32 to vector<4x256xi32>
    %53 = arith.select %51, %4, %52 : vector<4x256xi1>, vector<4x256xi32>
    %cst_17 = arith.constant dense<2147483647> : vector<4xi32>
    %54 = vector.multi_reduction <minsi>, %53, %cst_17 [1] : vector<4x256xi32> to vector<4xi32>
    %55 = vector.shape_cast %54 : vector<4xi32> to vector<4x1xi32>
    %56 = vector.broadcast %55 : vector<4x1xi32> to vector<4x256xi32>
    %57 = arith.cmpi eq, %4, %56 : vector<4x256xi32>
    %cst_18 = arith.constant 0xFF800000 : f32
    %58 = vector.broadcast %cst_18 : f32 to vector<4x256xf32>
    %59 = arith.select %57, %58, %46 : vector<4x256xi1>, vector<4x256xf32>
    %c4_i32 = arith.constant 4 : i32
    %cst_19 = arith.constant dense<0xFF800000> : vector<4xf32>
    %60 = vector.multi_reduction <maximumf>, %59, %cst_19 [1] : vector<4x256xf32> to vector<4xf32>
    %61 = vector.shape_cast %60 : vector<4xf32> to vector<4x1xf32>
    %62 = arith.addf %49, %61 : vector<4x1xf32>
    %63 = vector.broadcast %61 : vector<4x1xf32> to vector<4x256xf32>
    %64 = arith.cmpf oeq, %59, %63 : vector<4x256xf32>
    %c256_i32_20 = arith.constant 256 : i32
    %65 = vector.broadcast %c256_i32_20 : i32 to vector<4x256xi32>
    %66 = arith.select %64, %4, %65 : vector<4x256xi1>, vector<4x256xi32>
    %cst_21 = arith.constant dense<2147483647> : vector<4xi32>
    %67 = vector.multi_reduction <minsi>, %66, %cst_21 [1] : vector<4x256xi32> to vector<4xi32>
    %68 = vector.shape_cast %67 : vector<4xi32> to vector<4x1xi32>
    %69 = vector.broadcast %68 : vector<4x1xi32> to vector<4x256xi32>
    %70 = arith.cmpi eq, %4, %69 : vector<4x256xi32>
    %cst_22 = arith.constant 0xFF800000 : f32
    %71 = vector.broadcast %cst_22 : f32 to vector<4x256xf32>
    %72 = arith.select %70, %71, %59 : vector<4x256xi1>, vector<4x256xf32>
    %c5_i32 = arith.constant 5 : i32
    %cst_23 = arith.constant dense<0xFF800000> : vector<4xf32>
    %73 = vector.multi_reduction <maximumf>, %72, %cst_23 [1] : vector<4x256xf32> to vector<4xf32>
    %74 = vector.shape_cast %73 : vector<4xf32> to vector<4x1xf32>
    %75 = arith.addf %62, %74 : vector<4x1xf32>
    %76 = vector.broadcast %74 : vector<4x1xf32> to vector<4x256xf32>
    %77 = arith.cmpf oeq, %72, %76 : vector<4x256xf32>
    %c256_i32_24 = arith.constant 256 : i32
    %78 = vector.broadcast %c256_i32_24 : i32 to vector<4x256xi32>
    %79 = arith.select %77, %4, %78 : vector<4x256xi1>, vector<4x256xi32>
    %cst_25 = arith.constant dense<2147483647> : vector<4xi32>
    %80 = vector.multi_reduction <minsi>, %79, %cst_25 [1] : vector<4x256xi32> to vector<4xi32>
    %81 = vector.shape_cast %80 : vector<4xi32> to vector<4x1xi32>
    %82 = vector.broadcast %81 : vector<4x1xi32> to vector<4x256xi32>
    %83 = arith.cmpi eq, %4, %82 : vector<4x256xi32>
    %cst_26 = arith.constant 0xFF800000 : f32
    %84 = vector.broadcast %cst_26 : f32 to vector<4x256xf32>
    %85 = arith.select %83, %84, %72 : vector<4x256xi1>, vector<4x256xf32>
    %c6_i32 = arith.constant 6 : i32
    %cst_27 = arith.constant dense<0xFF800000> : vector<4xf32>
    %86 = vector.multi_reduction <maximumf>, %85, %cst_27 [1] : vector<4x256xf32> to vector<4xf32>
    %87 = vector.shape_cast %86 : vector<4xf32> to vector<4x1xf32>
    %88 = arith.addf %75, %87 : vector<4x1xf32>
    %89 = vector.broadcast %87 : vector<4x1xf32> to vector<4x256xf32>
    %90 = arith.cmpf oeq, %85, %89 : vector<4x256xf32>
    %c256_i32_28 = arith.constant 256 : i32
    %91 = vector.broadcast %c256_i32_28 : i32 to vector<4x256xi32>
    %92 = arith.select %90, %4, %91 : vector<4x256xi1>, vector<4x256xi32>
    %cst_29 = arith.constant dense<2147483647> : vector<4xi32>
    %93 = vector.multi_reduction <minsi>, %92, %cst_29 [1] : vector<4x256xi32> to vector<4xi32>
    %94 = vector.shape_cast %93 : vector<4xi32> to vector<4x1xi32>
    %95 = vector.broadcast %94 : vector<4x1xi32> to vector<4x256xi32>
    %96 = arith.cmpi eq, %4, %95 : vector<4x256xi32>
    %cst_30 = arith.constant 0xFF800000 : f32
    %97 = vector.broadcast %cst_30 : f32 to vector<4x256xf32>
    %98 = arith.select %96, %97, %85 : vector<4x256xi1>, vector<4x256xf32>
    %c7_i32 = arith.constant 7 : i32
    %cst_31 = arith.constant dense<0xFF800000> : vector<4xf32>
    %99 = vector.multi_reduction <maximumf>, %98, %cst_31 [1] : vector<4x256xf32> to vector<4xf32>
    %100 = vector.shape_cast %99 : vector<4xf32> to vector<4x1xf32>
    %101 = arith.addf %88, %100 : vector<4x1xf32>
    %102 = vector.broadcast %100 : vector<4x1xf32> to vector<4x256xf32>
    %103 = arith.cmpf oeq, %98, %102 : vector<4x256xf32>
    %c256_i32_32 = arith.constant 256 : i32
    %104 = vector.broadcast %c256_i32_32 : i32 to vector<4x256xi32>
    %105 = arith.select %103, %4, %104 : vector<4x256xi1>, vector<4x256xi32>
    %cst_33 = arith.constant dense<2147483647> : vector<4xi32>
    %106 = vector.multi_reduction <minsi>, %105, %cst_33 [1] : vector<4x256xi32> to vector<4xi32>
    %107 = vector.shape_cast %106 : vector<4xi32> to vector<4x1xi32>
    %108 = vector.broadcast %107 : vector<4x1xi32> to vector<4x256xi32>
    %109 = arith.cmpi eq, %4, %108 : vector<4x256xi32>
    %cst_34 = arith.constant 0xFF800000 : f32
    %110 = vector.broadcast %cst_34 : f32 to vector<4x256xf32>
    %111 = arith.select %109, %110, %98 : vector<4x256xi1>, vector<4x256xf32>
    %c8_i32 = arith.constant 8 : i32
    %cst_35 = arith.constant dense<0xFF800000> : vector<4xf32>
    %112 = vector.multi_reduction <maximumf>, %111, %cst_35 [1] : vector<4x256xf32> to vector<4xf32>
    %113 = vector.shape_cast %112 : vector<4xf32> to vector<4x1xf32>
    %114 = arith.addf %101, %113 : vector<4x1xf32>
    %115 = vector.broadcast %113 : vector<4x1xf32> to vector<4x256xf32>
    %116 = arith.cmpf oeq, %111, %115 : vector<4x256xf32>
    %c256_i32_36 = arith.constant 256 : i32
    %117 = vector.broadcast %c256_i32_36 : i32 to vector<4x256xi32>
    %118 = arith.select %116, %4, %117 : vector<4x256xi1>, vector<4x256xi32>
    %cst_37 = arith.constant dense<2147483647> : vector<4xi32>
    %119 = vector.multi_reduction <minsi>, %118, %cst_37 [1] : vector<4x256xi32> to vector<4xi32>
    %120 = vector.shape_cast %119 : vector<4xi32> to vector<4x1xi32>
    %121 = vector.broadcast %120 : vector<4x1xi32> to vector<4x256xi32>
    %122 = arith.cmpi eq, %4, %121 : vector<4x256xi32>
    %cst_38 = arith.constant 0xFF800000 : f32
    %123 = vector.broadcast %cst_38 : f32 to vector<4x256xf32>
    %124 = arith.select %122, %123, %111 : vector<4x256xi1>, vector<4x256xf32>
    %c9_i32 = arith.constant 9 : i32
    %cst_39 = arith.constant dense<0xFF800000> : vector<4xf32>
    %125 = vector.multi_reduction <maximumf>, %124, %cst_39 [1] : vector<4x256xf32> to vector<4xf32>
    %126 = vector.shape_cast %125 : vector<4xf32> to vector<4x1xf32>
    %127 = arith.addf %114, %126 : vector<4x1xf32>
    %128 = vector.broadcast %126 : vector<4x1xf32> to vector<4x256xf32>
    %129 = arith.cmpf oeq, %124, %128 : vector<4x256xf32>
    %c256_i32_40 = arith.constant 256 : i32
    %130 = vector.broadcast %c256_i32_40 : i32 to vector<4x256xi32>
    %131 = arith.select %129, %4, %130 : vector<4x256xi1>, vector<4x256xi32>
    %cst_41 = arith.constant dense<2147483647> : vector<4xi32>
    %132 = vector.multi_reduction <minsi>, %131, %cst_41 [1] : vector<4x256xi32> to vector<4xi32>
    %133 = vector.shape_cast %132 : vector<4xi32> to vector<4x1xi32>
    %134 = vector.broadcast %133 : vector<4x1xi32> to vector<4x256xi32>
    %135 = arith.cmpi eq, %4, %134 : vector<4x256xi32>
    %cst_42 = arith.constant 0xFF800000 : f32
    %136 = vector.broadcast %cst_42 : f32 to vector<4x256xf32>
    %137 = arith.select %135, %136, %124 : vector<4x256xi1>, vector<4x256xf32>
    %c10_i32 = arith.constant 10 : i32
    %cst_43 = arith.constant dense<0xFF800000> : vector<4xf32>
    %138 = vector.multi_reduction <maximumf>, %137, %cst_43 [1] : vector<4x256xf32> to vector<4xf32>
    %139 = vector.shape_cast %138 : vector<4xf32> to vector<4x1xf32>
    %140 = arith.addf %127, %139 : vector<4x1xf32>
    %141 = vector.broadcast %139 : vector<4x1xf32> to vector<4x256xf32>
    %142 = arith.cmpf oeq, %137, %141 : vector<4x256xf32>
    %c256_i32_44 = arith.constant 256 : i32
    %143 = vector.broadcast %c256_i32_44 : i32 to vector<4x256xi32>
    %144 = arith.select %142, %4, %143 : vector<4x256xi1>, vector<4x256xi32>
    %cst_45 = arith.constant dense<2147483647> : vector<4xi32>
    %145 = vector.multi_reduction <minsi>, %144, %cst_45 [1] : vector<4x256xi32> to vector<4xi32>
    %146 = vector.shape_cast %145 : vector<4xi32> to vector<4x1xi32>
    %147 = vector.broadcast %146 : vector<4x1xi32> to vector<4x256xi32>
    %148 = arith.cmpi eq, %4, %147 : vector<4x256xi32>
    %cst_46 = arith.constant 0xFF800000 : f32
    %149 = vector.broadcast %cst_46 : f32 to vector<4x256xf32>
    %150 = arith.select %148, %149, %137 : vector<4x256xi1>, vector<4x256xf32>
    %c11_i32 = arith.constant 11 : i32
    %cst_47 = arith.constant dense<0xFF800000> : vector<4xf32>
    %151 = vector.multi_reduction <maximumf>, %150, %cst_47 [1] : vector<4x256xf32> to vector<4xf32>
    %152 = vector.shape_cast %151 : vector<4xf32> to vector<4x1xf32>
    %153 = arith.addf %140, %152 : vector<4x1xf32>
    %154 = vector.broadcast %152 : vector<4x1xf32> to vector<4x256xf32>
    %155 = arith.cmpf oeq, %150, %154 : vector<4x256xf32>
    %c256_i32_48 = arith.constant 256 : i32
    %156 = vector.broadcast %c256_i32_48 : i32 to vector<4x256xi32>
    %157 = arith.select %155, %4, %156 : vector<4x256xi1>, vector<4x256xi32>
    %cst_49 = arith.constant dense<2147483647> : vector<4xi32>
    %158 = vector.multi_reduction <minsi>, %157, %cst_49 [1] : vector<4x256xi32> to vector<4xi32>
    %159 = vector.shape_cast %158 : vector<4xi32> to vector<4x1xi32>
    %160 = vector.broadcast %159 : vector<4x1xi32> to vector<4x256xi32>
    %161 = arith.cmpi eq, %4, %160 : vector<4x256xi32>
    %cst_50 = arith.constant 0xFF800000 : f32
    %162 = vector.broadcast %cst_50 : f32 to vector<4x256xf32>
    %163 = arith.select %161, %162, %150 : vector<4x256xi1>, vector<4x256xf32>
    %c12_i32 = arith.constant 12 : i32
    %cst_51 = arith.constant dense<0xFF800000> : vector<4xf32>
    %164 = vector.multi_reduction <maximumf>, %163, %cst_51 [1] : vector<4x256xf32> to vector<4xf32>
    %165 = vector.shape_cast %164 : vector<4xf32> to vector<4x1xf32>
    %166 = arith.addf %153, %165 : vector<4x1xf32>
    %167 = vector.broadcast %165 : vector<4x1xf32> to vector<4x256xf32>
    %168 = arith.cmpf oeq, %163, %167 : vector<4x256xf32>
    %c256_i32_52 = arith.constant 256 : i32
    %169 = vector.broadcast %c256_i32_52 : i32 to vector<4x256xi32>
    %170 = arith.select %168, %4, %169 : vector<4x256xi1>, vector<4x256xi32>
    %cst_53 = arith.constant dense<2147483647> : vector<4xi32>
    %171 = vector.multi_reduction <minsi>, %170, %cst_53 [1] : vector<4x256xi32> to vector<4xi32>
    %172 = vector.shape_cast %171 : vector<4xi32> to vector<4x1xi32>
    %173 = vector.broadcast %172 : vector<4x1xi32> to vector<4x256xi32>
    %174 = arith.cmpi eq, %4, %173 : vector<4x256xi32>
    %cst_54 = arith.constant 0xFF800000 : f32
    %175 = vector.broadcast %cst_54 : f32 to vector<4x256xf32>
    %176 = arith.select %174, %175, %163 : vector<4x256xi1>, vector<4x256xf32>
    %c13_i32 = arith.constant 13 : i32
    %cst_55 = arith.constant dense<0xFF800000> : vector<4xf32>
    %177 = vector.multi_reduction <maximumf>, %176, %cst_55 [1] : vector<4x256xf32> to vector<4xf32>
    %178 = vector.shape_cast %177 : vector<4xf32> to vector<4x1xf32>
    %179 = arith.addf %166, %178 : vector<4x1xf32>
    %180 = vector.broadcast %178 : vector<4x1xf32> to vector<4x256xf32>
    %181 = arith.cmpf oeq, %176, %180 : vector<4x256xf32>
    %c256_i32_56 = arith.constant 256 : i32
    %182 = vector.broadcast %c256_i32_56 : i32 to vector<4x256xi32>
    %183 = arith.select %181, %4, %182 : vector<4x256xi1>, vector<4x256xi32>
    %cst_57 = arith.constant dense<2147483647> : vector<4xi32>
    %184 = vector.multi_reduction <minsi>, %183, %cst_57 [1] : vector<4x256xi32> to vector<4xi32>
    %185 = vector.shape_cast %184 : vector<4xi32> to vector<4x1xi32>
    %186 = vector.broadcast %185 : vector<4x1xi32> to vector<4x256xi32>
    %187 = arith.cmpi eq, %4, %186 : vector<4x256xi32>
    %cst_58 = arith.constant 0xFF800000 : f32
    %188 = vector.broadcast %cst_58 : f32 to vector<4x256xf32>
    %189 = arith.select %187, %188, %176 : vector<4x256xi1>, vector<4x256xf32>
    %c14_i32 = arith.constant 14 : i32
    %cst_59 = arith.constant dense<0xFF800000> : vector<4xf32>
    %190 = vector.multi_reduction <maximumf>, %189, %cst_59 [1] : vector<4x256xf32> to vector<4xf32>
    %191 = vector.shape_cast %190 : vector<4xf32> to vector<4x1xf32>
    %192 = arith.addf %179, %191 : vector<4x1xf32>
    %193 = vector.broadcast %191 : vector<4x1xf32> to vector<4x256xf32>
    %194 = arith.cmpf oeq, %189, %193 : vector<4x256xf32>
    %c256_i32_60 = arith.constant 256 : i32
    %195 = vector.broadcast %c256_i32_60 : i32 to vector<4x256xi32>
    %196 = arith.select %194, %4, %195 : vector<4x256xi1>, vector<4x256xi32>
    %cst_61 = arith.constant dense<2147483647> : vector<4xi32>
    %197 = vector.multi_reduction <minsi>, %196, %cst_61 [1] : vector<4x256xi32> to vector<4xi32>
    %198 = vector.shape_cast %197 : vector<4xi32> to vector<4x1xi32>
    %199 = vector.broadcast %198 : vector<4x1xi32> to vector<4x256xi32>
    %200 = arith.cmpi eq, %4, %199 : vector<4x256xi32>
    %cst_62 = arith.constant 0xFF800000 : f32
    %201 = vector.broadcast %cst_62 : f32 to vector<4x256xf32>
    %202 = arith.select %200, %201, %189 : vector<4x256xi1>, vector<4x256xf32>
    %c15_i32 = arith.constant 15 : i32
    %cst_63 = arith.constant dense<0xFF800000> : vector<4xf32>
    %203 = vector.multi_reduction <maximumf>, %202, %cst_63 [1] : vector<4x256xf32> to vector<4xf32>
    %204 = vector.shape_cast %203 : vector<4xf32> to vector<4x1xf32>
    %205 = arith.addf %192, %204 : vector<4x1xf32>
    %206 = vector.broadcast %204 : vector<4x1xf32> to vector<4x256xf32>
    %207 = arith.cmpf oeq, %202, %206 : vector<4x256xf32>
    %c256_i32_64 = arith.constant 256 : i32
    %208 = vector.broadcast %c256_i32_64 : i32 to vector<4x256xi32>
    %209 = arith.select %207, %4, %208 : vector<4x256xi1>, vector<4x256xi32>
    %cst_65 = arith.constant dense<2147483647> : vector<4xi32>
    %210 = vector.multi_reduction <minsi>, %209, %cst_65 [1] : vector<4x256xi32> to vector<4xi32>
    %211 = vector.shape_cast %210 : vector<4xi32> to vector<4x1xi32>
    %212 = vector.broadcast %211 : vector<4x1xi32> to vector<4x256xi32>
    %213 = arith.cmpi eq, %4, %212 : vector<4x256xi32>
    %cst_66 = arith.constant 0xFF800000 : f32
    %214 = vector.broadcast %cst_66 : f32 to vector<4x256xf32>
    %215 = arith.select %213, %214, %202 : vector<4x256xi1>, vector<4x256xf32>
    %c16_i32 = arith.constant 16 : i32
    %cst_67 = arith.constant dense<0xFF800000> : vector<4xf32>
    %216 = vector.multi_reduction <maximumf>, %215, %cst_67 [1] : vector<4x256xf32> to vector<4xf32>
    %217 = vector.shape_cast %216 : vector<4xf32> to vector<4x1xf32>
    %218 = arith.addf %205, %217 : vector<4x1xf32>
    %219 = vector.broadcast %217 : vector<4x1xf32> to vector<4x256xf32>
    %220 = arith.cmpf oeq, %215, %219 : vector<4x256xf32>
    %c256_i32_68 = arith.constant 256 : i32
    %221 = vector.broadcast %c256_i32_68 : i32 to vector<4x256xi32>
    %222 = arith.select %220, %4, %221 : vector<4x256xi1>, vector<4x256xi32>
    %cst_69 = arith.constant dense<2147483647> : vector<4xi32>
    %223 = vector.multi_reduction <minsi>, %222, %cst_69 [1] : vector<4x256xi32> to vector<4xi32>
    %224 = vector.shape_cast %223 : vector<4xi32> to vector<4x1xi32>
    %225 = vector.broadcast %224 : vector<4x1xi32> to vector<4x256xi32>
    %226 = arith.cmpi eq, %4, %225 : vector<4x256xi32>
    %cst_70 = arith.constant 0xFF800000 : f32
    %227 = vector.broadcast %cst_70 : f32 to vector<4x256xf32>
    %228 = arith.select %226, %227, %215 : vector<4x256xi1>, vector<4x256xf32>
    %c17_i32 = arith.constant 17 : i32
    %cst_71 = arith.constant dense<0xFF800000> : vector<4xf32>
    %229 = vector.multi_reduction <maximumf>, %228, %cst_71 [1] : vector<4x256xf32> to vector<4xf32>
    %230 = vector.shape_cast %229 : vector<4xf32> to vector<4x1xf32>
    %231 = arith.addf %218, %230 : vector<4x1xf32>
    %232 = vector.broadcast %230 : vector<4x1xf32> to vector<4x256xf32>
    %233 = arith.cmpf oeq, %228, %232 : vector<4x256xf32>
    %c256_i32_72 = arith.constant 256 : i32
    %234 = vector.broadcast %c256_i32_72 : i32 to vector<4x256xi32>
    %235 = arith.select %233, %4, %234 : vector<4x256xi1>, vector<4x256xi32>
    %cst_73 = arith.constant dense<2147483647> : vector<4xi32>
    %236 = vector.multi_reduction <minsi>, %235, %cst_73 [1] : vector<4x256xi32> to vector<4xi32>
    %237 = vector.shape_cast %236 : vector<4xi32> to vector<4x1xi32>
    %238 = vector.broadcast %237 : vector<4x1xi32> to vector<4x256xi32>
    %239 = arith.cmpi eq, %4, %238 : vector<4x256xi32>
    %cst_74 = arith.constant 0xFF800000 : f32
    %240 = vector.broadcast %cst_74 : f32 to vector<4x256xf32>
    %241 = arith.select %239, %240, %228 : vector<4x256xi1>, vector<4x256xf32>
    %c18_i32 = arith.constant 18 : i32
    %cst_75 = arith.constant dense<0xFF800000> : vector<4xf32>
    %242 = vector.multi_reduction <maximumf>, %241, %cst_75 [1] : vector<4x256xf32> to vector<4xf32>
    %243 = vector.shape_cast %242 : vector<4xf32> to vector<4x1xf32>
    %244 = arith.addf %231, %243 : vector<4x1xf32>
    %245 = vector.broadcast %243 : vector<4x1xf32> to vector<4x256xf32>
    %246 = arith.cmpf oeq, %241, %245 : vector<4x256xf32>
    %c256_i32_76 = arith.constant 256 : i32
    %247 = vector.broadcast %c256_i32_76 : i32 to vector<4x256xi32>
    %248 = arith.select %246, %4, %247 : vector<4x256xi1>, vector<4x256xi32>
    %cst_77 = arith.constant dense<2147483647> : vector<4xi32>
    %249 = vector.multi_reduction <minsi>, %248, %cst_77 [1] : vector<4x256xi32> to vector<4xi32>
    %250 = vector.shape_cast %249 : vector<4xi32> to vector<4x1xi32>
    %251 = vector.broadcast %250 : vector<4x1xi32> to vector<4x256xi32>
    %252 = arith.cmpi eq, %4, %251 : vector<4x256xi32>
    %cst_78 = arith.constant 0xFF800000 : f32
    %253 = vector.broadcast %cst_78 : f32 to vector<4x256xf32>
    %254 = arith.select %252, %253, %241 : vector<4x256xi1>, vector<4x256xf32>
    %c19_i32 = arith.constant 19 : i32
    %cst_79 = arith.constant dense<0xFF800000> : vector<4xf32>
    %255 = vector.multi_reduction <maximumf>, %254, %cst_79 [1] : vector<4x256xf32> to vector<4xf32>
    %256 = vector.shape_cast %255 : vector<4xf32> to vector<4x1xf32>
    %257 = arith.addf %244, %256 : vector<4x1xf32>
    %258 = vector.broadcast %256 : vector<4x1xf32> to vector<4x256xf32>
    %259 = arith.cmpf oeq, %254, %258 : vector<4x256xf32>
    %c256_i32_80 = arith.constant 256 : i32
    %260 = vector.broadcast %c256_i32_80 : i32 to vector<4x256xi32>
    %261 = arith.select %259, %4, %260 : vector<4x256xi1>, vector<4x256xi32>
    %cst_81 = arith.constant dense<2147483647> : vector<4xi32>
    %262 = vector.multi_reduction <minsi>, %261, %cst_81 [1] : vector<4x256xi32> to vector<4xi32>
    %263 = vector.shape_cast %262 : vector<4xi32> to vector<4x1xi32>
    %264 = vector.broadcast %263 : vector<4x1xi32> to vector<4x256xi32>
    %265 = arith.cmpi eq, %4, %264 : vector<4x256xi32>
    %cst_82 = arith.constant 0xFF800000 : f32
    %266 = vector.broadcast %cst_82 : f32 to vector<4x256xf32>
    %267 = arith.select %265, %266, %254 : vector<4x256xi1>, vector<4x256xf32>
    %c20_i32 = arith.constant 20 : i32
    %cst_83 = arith.constant dense<0xFF800000> : vector<4xf32>
    %268 = vector.multi_reduction <maximumf>, %267, %cst_83 [1] : vector<4x256xf32> to vector<4xf32>
    %269 = vector.shape_cast %268 : vector<4xf32> to vector<4x1xf32>
    %270 = arith.addf %257, %269 : vector<4x1xf32>
    %271 = vector.broadcast %269 : vector<4x1xf32> to vector<4x256xf32>
    %272 = arith.cmpf oeq, %267, %271 : vector<4x256xf32>
    %c256_i32_84 = arith.constant 256 : i32
    %273 = vector.broadcast %c256_i32_84 : i32 to vector<4x256xi32>
    %274 = arith.select %272, %4, %273 : vector<4x256xi1>, vector<4x256xi32>
    %cst_85 = arith.constant dense<2147483647> : vector<4xi32>
    %275 = vector.multi_reduction <minsi>, %274, %cst_85 [1] : vector<4x256xi32> to vector<4xi32>
    %276 = vector.shape_cast %275 : vector<4xi32> to vector<4x1xi32>
    %277 = vector.broadcast %276 : vector<4x1xi32> to vector<4x256xi32>
    %278 = arith.cmpi eq, %4, %277 : vector<4x256xi32>
    %cst_86 = arith.constant 0xFF800000 : f32
    %279 = vector.broadcast %cst_86 : f32 to vector<4x256xf32>
    %280 = arith.select %278, %279, %267 : vector<4x256xi1>, vector<4x256xf32>
    %c21_i32 = arith.constant 21 : i32
    %cst_87 = arith.constant dense<0xFF800000> : vector<4xf32>
    %281 = vector.multi_reduction <maximumf>, %280, %cst_87 [1] : vector<4x256xf32> to vector<4xf32>
    %282 = vector.shape_cast %281 : vector<4xf32> to vector<4x1xf32>
    %283 = arith.addf %270, %282 : vector<4x1xf32>
    %284 = vector.broadcast %282 : vector<4x1xf32> to vector<4x256xf32>
    %285 = arith.cmpf oeq, %280, %284 : vector<4x256xf32>
    %c256_i32_88 = arith.constant 256 : i32
    %286 = vector.broadcast %c256_i32_88 : i32 to vector<4x256xi32>
    %287 = arith.select %285, %4, %286 : vector<4x256xi1>, vector<4x256xi32>
    %cst_89 = arith.constant dense<2147483647> : vector<4xi32>
    %288 = vector.multi_reduction <minsi>, %287, %cst_89 [1] : vector<4x256xi32> to vector<4xi32>
    %289 = vector.shape_cast %288 : vector<4xi32> to vector<4x1xi32>
    %290 = vector.broadcast %289 : vector<4x1xi32> to vector<4x256xi32>
    %291 = arith.cmpi eq, %4, %290 : vector<4x256xi32>
    %cst_90 = arith.constant 0xFF800000 : f32
    %292 = vector.broadcast %cst_90 : f32 to vector<4x256xf32>
    %293 = arith.select %291, %292, %280 : vector<4x256xi1>, vector<4x256xf32>
    %c22_i32 = arith.constant 22 : i32
    %cst_91 = arith.constant dense<0xFF800000> : vector<4xf32>
    %294 = vector.multi_reduction <maximumf>, %293, %cst_91 [1] : vector<4x256xf32> to vector<4xf32>
    %295 = vector.shape_cast %294 : vector<4xf32> to vector<4x1xf32>
    %296 = arith.addf %283, %295 : vector<4x1xf32>
    %297 = vector.broadcast %295 : vector<4x1xf32> to vector<4x256xf32>
    %298 = arith.cmpf oeq, %293, %297 : vector<4x256xf32>
    %c256_i32_92 = arith.constant 256 : i32
    %299 = vector.broadcast %c256_i32_92 : i32 to vector<4x256xi32>
    %300 = arith.select %298, %4, %299 : vector<4x256xi1>, vector<4x256xi32>
    %cst_93 = arith.constant dense<2147483647> : vector<4xi32>
    %301 = vector.multi_reduction <minsi>, %300, %cst_93 [1] : vector<4x256xi32> to vector<4xi32>
    %302 = vector.shape_cast %301 : vector<4xi32> to vector<4x1xi32>
    %303 = vector.broadcast %302 : vector<4x1xi32> to vector<4x256xi32>
    %304 = arith.cmpi eq, %4, %303 : vector<4x256xi32>
    %cst_94 = arith.constant 0xFF800000 : f32
    %305 = vector.broadcast %cst_94 : f32 to vector<4x256xf32>
    %306 = arith.select %304, %305, %293 : vector<4x256xi1>, vector<4x256xf32>
    %c23_i32 = arith.constant 23 : i32
    %cst_95 = arith.constant dense<0xFF800000> : vector<4xf32>
    %307 = vector.multi_reduction <maximumf>, %306, %cst_95 [1] : vector<4x256xf32> to vector<4xf32>
    %308 = vector.shape_cast %307 : vector<4xf32> to vector<4x1xf32>
    %309 = arith.addf %296, %308 : vector<4x1xf32>
    %310 = vector.broadcast %308 : vector<4x1xf32> to vector<4x256xf32>
    %311 = arith.cmpf oeq, %306, %310 : vector<4x256xf32>
    %c256_i32_96 = arith.constant 256 : i32
    %312 = vector.broadcast %c256_i32_96 : i32 to vector<4x256xi32>
    %313 = arith.select %311, %4, %312 : vector<4x256xi1>, vector<4x256xi32>
    %cst_97 = arith.constant dense<2147483647> : vector<4xi32>
    %314 = vector.multi_reduction <minsi>, %313, %cst_97 [1] : vector<4x256xi32> to vector<4xi32>
    %315 = vector.shape_cast %314 : vector<4xi32> to vector<4x1xi32>
    %316 = vector.broadcast %315 : vector<4x1xi32> to vector<4x256xi32>
    %317 = arith.cmpi eq, %4, %316 : vector<4x256xi32>
    %cst_98 = arith.constant 0xFF800000 : f32
    %318 = vector.broadcast %cst_98 : f32 to vector<4x256xf32>
    %319 = arith.select %317, %318, %306 : vector<4x256xi1>, vector<4x256xf32>
    %c24_i32 = arith.constant 24 : i32
    %cst_99 = arith.constant dense<0xFF800000> : vector<4xf32>
    %320 = vector.multi_reduction <maximumf>, %319, %cst_99 [1] : vector<4x256xf32> to vector<4xf32>
    %321 = vector.shape_cast %320 : vector<4xf32> to vector<4x1xf32>
    %322 = arith.addf %309, %321 : vector<4x1xf32>
    %323 = vector.broadcast %321 : vector<4x1xf32> to vector<4x256xf32>
    %324 = arith.cmpf oeq, %319, %323 : vector<4x256xf32>
    %c256_i32_100 = arith.constant 256 : i32
    %325 = vector.broadcast %c256_i32_100 : i32 to vector<4x256xi32>
    %326 = arith.select %324, %4, %325 : vector<4x256xi1>, vector<4x256xi32>
    %cst_101 = arith.constant dense<2147483647> : vector<4xi32>
    %327 = vector.multi_reduction <minsi>, %326, %cst_101 [1] : vector<4x256xi32> to vector<4xi32>
    %328 = vector.shape_cast %327 : vector<4xi32> to vector<4x1xi32>
    %329 = vector.broadcast %328 : vector<4x1xi32> to vector<4x256xi32>
    %330 = arith.cmpi eq, %4, %329 : vector<4x256xi32>
    %cst_102 = arith.constant 0xFF800000 : f32
    %331 = vector.broadcast %cst_102 : f32 to vector<4x256xf32>
    %332 = arith.select %330, %331, %319 : vector<4x256xi1>, vector<4x256xf32>
    %c25_i32 = arith.constant 25 : i32
    %cst_103 = arith.constant dense<0xFF800000> : vector<4xf32>
    %333 = vector.multi_reduction <maximumf>, %332, %cst_103 [1] : vector<4x256xf32> to vector<4xf32>
    %334 = vector.shape_cast %333 : vector<4xf32> to vector<4x1xf32>
    %335 = arith.addf %322, %334 : vector<4x1xf32>
    %336 = vector.broadcast %334 : vector<4x1xf32> to vector<4x256xf32>
    %337 = arith.cmpf oeq, %332, %336 : vector<4x256xf32>
    %c256_i32_104 = arith.constant 256 : i32
    %338 = vector.broadcast %c256_i32_104 : i32 to vector<4x256xi32>
    %339 = arith.select %337, %4, %338 : vector<4x256xi1>, vector<4x256xi32>
    %cst_105 = arith.constant dense<2147483647> : vector<4xi32>
    %340 = vector.multi_reduction <minsi>, %339, %cst_105 [1] : vector<4x256xi32> to vector<4xi32>
    %341 = vector.shape_cast %340 : vector<4xi32> to vector<4x1xi32>
    %342 = vector.broadcast %341 : vector<4x1xi32> to vector<4x256xi32>
    %343 = arith.cmpi eq, %4, %342 : vector<4x256xi32>
    %cst_106 = arith.constant 0xFF800000 : f32
    %344 = vector.broadcast %cst_106 : f32 to vector<4x256xf32>
    %345 = arith.select %343, %344, %332 : vector<4x256xi1>, vector<4x256xf32>
    %c26_i32 = arith.constant 26 : i32
    %cst_107 = arith.constant dense<0xFF800000> : vector<4xf32>
    %346 = vector.multi_reduction <maximumf>, %345, %cst_107 [1] : vector<4x256xf32> to vector<4xf32>
    %347 = vector.shape_cast %346 : vector<4xf32> to vector<4x1xf32>
    %348 = arith.addf %335, %347 : vector<4x1xf32>
    %349 = vector.broadcast %347 : vector<4x1xf32> to vector<4x256xf32>
    %350 = arith.cmpf oeq, %345, %349 : vector<4x256xf32>
    %c256_i32_108 = arith.constant 256 : i32
    %351 = vector.broadcast %c256_i32_108 : i32 to vector<4x256xi32>
    %352 = arith.select %350, %4, %351 : vector<4x256xi1>, vector<4x256xi32>
    %cst_109 = arith.constant dense<2147483647> : vector<4xi32>
    %353 = vector.multi_reduction <minsi>, %352, %cst_109 [1] : vector<4x256xi32> to vector<4xi32>
    %354 = vector.shape_cast %353 : vector<4xi32> to vector<4x1xi32>
    %355 = vector.broadcast %354 : vector<4x1xi32> to vector<4x256xi32>
    %356 = arith.cmpi eq, %4, %355 : vector<4x256xi32>
    %cst_110 = arith.constant 0xFF800000 : f32
    %357 = vector.broadcast %cst_110 : f32 to vector<4x256xf32>
    %358 = arith.select %356, %357, %345 : vector<4x256xi1>, vector<4x256xf32>
    %c27_i32 = arith.constant 27 : i32
    %cst_111 = arith.constant dense<0xFF800000> : vector<4xf32>
    %359 = vector.multi_reduction <maximumf>, %358, %cst_111 [1] : vector<4x256xf32> to vector<4xf32>
    %360 = vector.shape_cast %359 : vector<4xf32> to vector<4x1xf32>
    %361 = arith.addf %348, %360 : vector<4x1xf32>
    %362 = vector.broadcast %360 : vector<4x1xf32> to vector<4x256xf32>
    %363 = arith.cmpf oeq, %358, %362 : vector<4x256xf32>
    %c256_i32_112 = arith.constant 256 : i32
    %364 = vector.broadcast %c256_i32_112 : i32 to vector<4x256xi32>
    %365 = arith.select %363, %4, %364 : vector<4x256xi1>, vector<4x256xi32>
    %cst_113 = arith.constant dense<2147483647> : vector<4xi32>
    %366 = vector.multi_reduction <minsi>, %365, %cst_113 [1] : vector<4x256xi32> to vector<4xi32>
    %367 = vector.shape_cast %366 : vector<4xi32> to vector<4x1xi32>
    %368 = vector.broadcast %367 : vector<4x1xi32> to vector<4x256xi32>
    %369 = arith.cmpi eq, %4, %368 : vector<4x256xi32>
    %cst_114 = arith.constant 0xFF800000 : f32
    %370 = vector.broadcast %cst_114 : f32 to vector<4x256xf32>
    %371 = arith.select %369, %370, %358 : vector<4x256xi1>, vector<4x256xf32>
    %c28_i32 = arith.constant 28 : i32
    %cst_115 = arith.constant dense<0xFF800000> : vector<4xf32>
    %372 = vector.multi_reduction <maximumf>, %371, %cst_115 [1] : vector<4x256xf32> to vector<4xf32>
    %373 = vector.shape_cast %372 : vector<4xf32> to vector<4x1xf32>
    %374 = arith.addf %361, %373 : vector<4x1xf32>
    %375 = vector.broadcast %373 : vector<4x1xf32> to vector<4x256xf32>
    %376 = arith.cmpf oeq, %371, %375 : vector<4x256xf32>
    %c256_i32_116 = arith.constant 256 : i32
    %377 = vector.broadcast %c256_i32_116 : i32 to vector<4x256xi32>
    %378 = arith.select %376, %4, %377 : vector<4x256xi1>, vector<4x256xi32>
    %cst_117 = arith.constant dense<2147483647> : vector<4xi32>
    %379 = vector.multi_reduction <minsi>, %378, %cst_117 [1] : vector<4x256xi32> to vector<4xi32>
    %380 = vector.shape_cast %379 : vector<4xi32> to vector<4x1xi32>
    %381 = vector.broadcast %380 : vector<4x1xi32> to vector<4x256xi32>
    %382 = arith.cmpi eq, %4, %381 : vector<4x256xi32>
    %cst_118 = arith.constant 0xFF800000 : f32
    %383 = vector.broadcast %cst_118 : f32 to vector<4x256xf32>
    %384 = arith.select %382, %383, %371 : vector<4x256xi1>, vector<4x256xf32>
    %c29_i32 = arith.constant 29 : i32
    %cst_119 = arith.constant dense<0xFF800000> : vector<4xf32>
    %385 = vector.multi_reduction <maximumf>, %384, %cst_119 [1] : vector<4x256xf32> to vector<4xf32>
    %386 = vector.shape_cast %385 : vector<4xf32> to vector<4x1xf32>
    %387 = arith.addf %374, %386 : vector<4x1xf32>
    %388 = vector.broadcast %386 : vector<4x1xf32> to vector<4x256xf32>
    %389 = arith.cmpf oeq, %384, %388 : vector<4x256xf32>
    %c256_i32_120 = arith.constant 256 : i32
    %390 = vector.broadcast %c256_i32_120 : i32 to vector<4x256xi32>
    %391 = arith.select %389, %4, %390 : vector<4x256xi1>, vector<4x256xi32>
    %cst_121 = arith.constant dense<2147483647> : vector<4xi32>
    %392 = vector.multi_reduction <minsi>, %391, %cst_121 [1] : vector<4x256xi32> to vector<4xi32>
    %393 = vector.shape_cast %392 : vector<4xi32> to vector<4x1xi32>
    %394 = vector.broadcast %393 : vector<4x1xi32> to vector<4x256xi32>
    %395 = arith.cmpi eq, %4, %394 : vector<4x256xi32>
    %cst_122 = arith.constant 0xFF800000 : f32
    %396 = vector.broadcast %cst_122 : f32 to vector<4x256xf32>
    %397 = arith.select %395, %396, %384 : vector<4x256xi1>, vector<4x256xf32>
    %c30_i32 = arith.constant 30 : i32
    %cst_123 = arith.constant dense<0xFF800000> : vector<4xf32>
    %398 = vector.multi_reduction <maximumf>, %397, %cst_123 [1] : vector<4x256xf32> to vector<4xf32>
    %399 = vector.shape_cast %398 : vector<4xf32> to vector<4x1xf32>
    %400 = arith.addf %387, %399 : vector<4x1xf32>
    %401 = vector.broadcast %399 : vector<4x1xf32> to vector<4x256xf32>
    %402 = arith.cmpf oeq, %397, %401 : vector<4x256xf32>
    %c256_i32_124 = arith.constant 256 : i32
    %403 = vector.broadcast %c256_i32_124 : i32 to vector<4x256xi32>
    %404 = arith.select %402, %4, %403 : vector<4x256xi1>, vector<4x256xi32>
    %cst_125 = arith.constant dense<2147483647> : vector<4xi32>
    %405 = vector.multi_reduction <minsi>, %404, %cst_125 [1] : vector<4x256xi32> to vector<4xi32>
    %406 = vector.shape_cast %405 : vector<4xi32> to vector<4x1xi32>
    %407 = vector.broadcast %406 : vector<4x1xi32> to vector<4x256xi32>
    %408 = arith.cmpi eq, %4, %407 : vector<4x256xi32>
    %cst_126 = arith.constant 0xFF800000 : f32
    %409 = vector.broadcast %cst_126 : f32 to vector<4x256xf32>
    %410 = arith.select %408, %409, %397 : vector<4x256xi1>, vector<4x256xf32>
    %cst_127 = arith.constant -1.000000e+00 : f32
    %411 = vector.broadcast %cst_127 : f32 to vector<4x1xf32>
    %412 = arith.mulf %400, %411 : vector<4x1xf32>
    %413 = arith.subf %3, %412 : vector<4x1xf32>
    %cst_128 = arith.constant 0.00444444455 : f32
    %414 = vector.broadcast %cst_128 : f32 to vector<4x1xf32>
    %415 = arith.mulf %413, %414 : vector<4x1xf32>
    %c0_129 = arith.constant 0 : index
    %c0_130 = arith.constant 0 : index
    %416 = vector.load %arg2[%c0_129, %c0_130] : memref<4x2xf32, #tpu.memory_space<vmem>>, vector<4x2xf32>
    %417 = vector.broadcast %415 : vector<4x1xf32> to vector<4x2xf32>
    %418 = arith.mulf %416, %417 : vector<4x2xf32>
    %cst_131 = arith.constant dense<0.000000e+00> : vector<2xf32>
    %419 = vector.multi_reduction <add>, %418, %cst_131 [0] : vector<4x2xf32> to vector<2xf32>
    %420 = vector.shape_cast %419 : vector<2xf32> to vector<1x2xf32>
    %c0_132 = arith.constant 0 : index
    %c0_133 = arith.constant 0 : index
    %421 = vector.load %arg3[%c0_132, %c0_133] : memref<4x2xf32, #tpu.memory_space<vmem>>, vector<4x2xf32>
    %422 = vector.broadcast %420 : vector<1x2xf32> to vector<4x2xf32>
    %423 = arith.mulf %421, %422 : vector<4x2xf32>
    %cst_134 = arith.constant dense<0.000000e+00> : vector<4xf32>
    %424 = vector.multi_reduction <add>, %423, %cst_134 [1] : vector<4x2xf32> to vector<4xf32>
    %425 = vector.shape_cast %424 : vector<4xf32> to vector<4x1xf32>
    %cst_135 = arith.constant 0.000000e+00 : f32
    %426 = vector.broadcast %cst_135 : f32 to vector<4x1xf32>
    %427 = arith.subf %426, %425 : vector<4x1xf32>
    %428 = math.exp %427 : vector<4x1xf32>
    %cst_136 = arith.constant 1.000000e+00 : f32
    %429 = vector.broadcast %cst_136 : f32 to vector<4x1xf32>
    %430 = arith.addf %429, %428 : vector<4x1xf32>
    %cst_137 = arith.constant 1.000000e+00 : f32
    %431 = vector.broadcast %cst_137 : f32 to vector<4x1xf32>
    %432 = arith.divf %431, %430 : vector<4x1xf32>
    %433 = vector.broadcast %432 : vector<4x1xf32> to vector<4x256xf32>
    %434 = arith.mulf %1, %433 : vector<4x256xf32>
    %c0_138 = arith.constant 0 : index
    %c0_139 = arith.constant 0 : index
    %c0_140 = arith.constant 0 : index
    %435 = vector.load %arg4[%c0_138, %c0_139, %c0_140] : memref<1x4x256xf32, #tpu.memory_space<vmem>>, vector<1x4x256xf32>
    %436 = vector.shape_cast %435 : vector<1x4x256xf32> to vector<4x256xf32>
    %437 = vector.shape_cast %434 : vector<4x256xf32> to vector<1x4x256xf32>
    tpu.vector_store %arg4[%c0_138, %c0_139, %c0_140], %437 {strides = array<i32>} : memref<1x4x256xf32, #tpu.memory_space<vmem>>, vector<1x4x256xf32>,
    return
  }
  func.func @transform_0(%arg0: i32) -> (i32, i32, i32) {
    %c0_i32 = arith.constant 0 : i32
    %c0_i32_0 = arith.constant 0 : i32
    %c0_i32_1 = arith.constant 0 : i32
    return %arg0, %c0_i32, %c0_i32_0 : i32, i32, i32
  }
  func.func @transform_1(%arg0: i32) -> (i32, i32) {
    %c0_i32 = arith.constant 0 : i32
    %c0_i32_0 = arith.constant 0 : i32
    %c0_i32_1 = arith.constant 0 : i32
    return %c0_i32, %c0_i32_0 : i32, i32
  }
  func.func @transform_2(%arg0: i32) -> (i32, i32) {
    %c0_i32 = arith.constant 0 : i32
    %c0_i32_0 = arith.constant 0 : i32
    %c0_i32_1 = arith.constant 0 : i32
    return %c0_i32, %c0_i32_0 : i32, i32
  }
  func.func @transform_3(%arg0: i32) -> (i32, i32, i32) {
    %c0_i32 = arith.constant 0 : i32
    %c0_i32_0 = arith.constant 0 : i32
    %c0_i32_1 = arith.constant 0 : i32
    return %arg0, %c0_i32, %c0_i32_0 : i32, i32, i32
  }
}

</mosaic_0001>

<bundles_post_ra>
// kernel: tpu_custom_call.1
= control target key start
LH: loop header
LB: loop body
LE: loop exit
PB: predicated region body
PF: predicated region fallthrough
CT: control target
= control target key end

     0   :  { %8 = vsyncpa [#allocation3], 0  ;;  %s2072_s0 = inlined_call_operand.hbm [shape: f32[2,4,256], index: 0, kind: input, shape index: {}]   ;;  %s2073_s1 = inlined_call_operand.vmem [shape: f32[4,2], index: 1, kind: input, shape index: {}]   ;;  %s2074_s2 = inlined_call_operand.vmem [shape: f32[4,2], index: 2, kind: input, shape index: {}]   ;;  %s2075_s3 = inlined_call_operand.hbm [shape: f32[2,4,256], index: 3, kind: output, shape index: {}]  }
   0x1   :  { %10 = vsyncpa [#allocation3 + $0x1], 0 }
   0x2   :  { %11 = vsyncpa [#allocation4], 0 }
   0x3   :  { %13 = vsyncpa [#allocation4 + $0x1], 0  ;;  %s1489_s12 = smov 0   ;;  %s1491_s13 = smov 0  }
   0x4   :  { %s1493_s14 = smov 0   ;;  %s1495_s15 = smov 0  }
   0x5 LB: > { %s1510_s16 = sadd.s32 4294967295, %s1464_s15   ;;  %s1299_s17 = sadd.s32 4294967294, %s1464_s15   ;;  %s1464_s15 = sphi %s1495_s15, %s2090_s15   ;;  %s1460_s14 = sphi %s1493_s14, %s2089_s14   ;;  %s1456_s13 = sphi %s1491_s13, %s2088_s13   ;;  %s1452_s12 = sphi %s1489_s12, %s2087_s12  }
   0x6   : > { %s1514_s18 = sadd.s32 1, %s1464_s15   ;;  %s26_s19 = sadd.s32 1, %s1460_s14 }
   0x7   : > { %s23_s20 = ssub.s32 %s1464_s15, %s1514_s18  ;;  %p33_p0 = scmp.ne.s32.totalorder %s1460_s14, %s1456_s13 }
   0x8   : > { %p24_p1 = scmp.eq.s32.totalorder %s23_s20, 0  ;;  %p34_p2 = scmp.eq.s32.totalorder %s1464_s15, 0 }
   0x9   : > { %p39_p3 = scmp.ne.s32.totalorder %s1456_s13, %s1452_s12  ;;  %p40_p4 = scmp.eq.s32.totalorder %s1510_s16, 0 }
   0xa   : > { %s1526_s21 = scalar_select %p24_p1, %s1460_s14, %s26_s19  }
   0xb   : > { %p1528_p5 = por %p34_p2, %p33_p0  ;;  %p1532_p6 = por %p40_p4, %p39_p3 }
   0xc   : > { %p105_p7 = scmp.eq.s32.totalorder %s1510_s16, 1  ;;  %p111_p8 = scmp.eq.s32.totalorder %s1299_s17, 1 }
   0xd   : > { %p1327_p10 = scmp.lt.s32.totalorder %s1464_s15, 2  ;;  %s137_s26 = sand.u32 1, %s1460_s14  }
   0xe   : > { %p1539_p11 = por %p105_p7, %p33_p0  ;;  %p1543_p12 = por %p111_p8, %p39_p3 }
   0xf   : > { %s1313_s27 = sshll.u32 %s1464_s15, 7  ;;  %s1302_s28 = sshll.u32 %s137_s26, 3 }
  0x10   : > { %s2079_s24 = scalar_select %p1539_p11, 1, 0 }
  0x11   : > { %s2080_s25 = scalar_select %p1543_p12, 1, 0 }
  0x12   : > { %s1552_s4 = scalar_lea.hbm %s2072_s0, %s1313_s27  ;;  %s141_s5 = scalar_lea.vmem [#allocation2], %s1302_s28 }
  0x13   : > { %s149_s6 = sshll.u32 %s141_s5, 4  ;;  %p1556_p13 = pnand %p1327_p10, %p1528_p5  ;;  %s1560_s6 = int_to_ptr.vmem [resolvable:$true] %s149_s6 }
  0x14   : > { %s138_s8 = scalar_lea.sflag [#allocation3], %s137_s26  ;;  %s1368_s9 = scalar_lea.hbm %s1552_s4, 128 }
  0x15   : > { %p1369_p2 = scmp.ne.s32.totalorder %s1552_s4, %s1368_s9  ;;  %p1370_p3 = pneg %p1556_p13 }
  0x16   : > { %s1373_s17 = scalar_lea.hbm %s2072_s0, 256  ;;  %p1374_p5 = scmp.lt.u32.totalorder %s1552_s4, %s2072_s0 }
  0x17   : > { %p1371_p4 = pnand %p1370_p3, %p1369_p2  ;;  %p1375_p8 = scmp.lt.u32.totalorder %s1373_s17, %s1368_s9 }
  0x18   : > { %p1377_p9 = scmp.lt.u32.totalorder %s1368_s9, %s1552_s4 }
  0x19   : > { %p1372_p7 = pneg %p1371_p4  ;;  %p1376_p10 = por %p1375_p8, %p1374_p5 }
  0x1b   : > { %p1378_p0 = por %p1377_p9, %p1376_p10 }
  0x1d   : > { %p1379_p1 = pnand %p1378_p0, %p1372_p7 }
  0x1f   : > { %1382 = shalt.err (!%p1379_p1)
}
  0x20   : > { %s1383_s22 = scalar_lea.vmem %s1560_s6, 128  ;;  %s1466_s26 = smov [#allocation2]  }
  0x21   : > { %p1384_p2 = scmp.ne.s32.totalorder %s1560_s6, %s1383_s22  ;;  %s1388_s27 = sshll.u32 %s1466_s26, 4  ;;  %s1389_s27 = int_to_ptr.vmem [resolvable:$false] %s1388_s27 }
  0x22   : > { %s1390_s28 = scalar_lea.vmem %s1389_s27, 256  ;;  %p1391_p11 = scmp.lt.s32.totalorder %s1560_s6, %s1389_s27 }
  0x23   : > { %p1386_p4 = pnand %p1384_p2, %p1370_p3  ;;  %p1392_p5 = scmp.lt.s32.totalorder %s1390_s28, %s1383_s22 }
  0x25   : > { %p1387_p12 = pneg %p1386_p4  ;;  %p1393_p8 = por %p1392_p5, %p1391_p11 }
  0x27   : > { %p1394_p9 = pnand %p1393_p8, %p1387_p12 }
  0x29   : > { %1397 = shalt.err (!%p1394_p9)
}
  0x2a   : > { %1322 = dma.hbm_to_vmem [thread:$0]  (!%p1556_p13), %s1552_s4, 128, %s1560_s6, %s138_s8  }
  0x2b   : > { %p2082_p0 = scmp.lt.s32.totalorder %s1464_s15, 3  ;;  %p2083_p1 = scmp.ge.s32.totalorder %s1464_s15, 1 }
  0x2d   : > { %p155_p3 = pnand %p2083_p1, %p2082_p0 }
  0x2e   : > { %s1594_s29 = sand.u32 (!%p155_p3), 1, %s1456_s13  }
  0x2f   : > { %158 = sbr.rel (%p155_p3) target bundleno = 13803 (0x35eb), region = 32  ;;  %s1306_s30 = sshll.u32 (!%p155_p3), %s1594_s29, 3 }
  0x30   : > { %s161_s5 = scalar_lea.sflag (!%p155_p3), [#allocation3], %s1594_s29  ;;  %s1600_s7 = scalar_lea.vmem (!%p155_p3), [#allocation2], %s1306_s30 }
  0x36   : > { %1443 = dma.done.wait (%p1532_p6), %s161_s5, 128  }
  0x37   : > { %1445 = vsyncadd (%p1532_p6), %s161_s5, 4294967168  ;;  %v187_v0 = vld [vmem:[%s1600_s7] sm:$0xff]  ;;  %vm191_vm0 = vcmask 1043456   ;;  %v197_v6 = vlaneseq  ;;  %v1467_v7 = vmov 839922192   ;;  %s1314_s9 = sshll.u32 %s1510_s16, 7 }
  0x38   : > { %v200_v1 = vmul.f32 -1.0, %v187_v0  ;;  %v212_v8 = vunpack.c.l.s4 %v1467_v7  ;;  %s186_s10 = scalar_lea.vmem [#allocation5], %s1306_s30  ;;  %s2028_s20 = scalar_lea.hbm %s2075_s3, %s1314_s9 }
  0x39   : > { %v1609_v9 = vand.u32 127, %v197_v6  ;;  %v215_v11 = vshrl.u32 %v197_v6, 7  ;;  %s1229_s11 = sshll.u32 %s186_s10, 4  ;;  %s1215_s22 = scalar_lea.sflag [#allocation4], %s1594_s29  ;;  %s2030_s11 = int_to_ptr.vmem [resolvable:$true] %s1229_s11 }
  0x3a   : > { %v202_v2 = vcombine.high %v200_v1, %v200_v1  ;;  %v204_v3 = vsel %vm191_vm0, %v200_v1, -inf  ;;  %v213_v10 = vunpack.c.0.s8 %v212_v8  ;;  %s1398_s16 = scalar_lea.vmem %s2030_s11, 128  ;;  %p2084_p11 = scmp.ne.s32.totalorder %s2079_s24, 0 }
  0x3b   : > { %v1612_v12 = vadd.s32 128, %v1609_v9  ;;  %p1399_p6 = scmp.ne.s32.totalorder %s2030_s11, %s1398_s16  ;;  %s1468_s26 = smov [#allocation5]  }
  0x3c   : > { %v205_v4 = vsel %vm191_vm0, %v202_v2, -inf  ;;  %v1614_v13 = vsub.s32 %v213_v10, %v215_v11  ;;  %s1402_s27 = sshll.u32 %s1468_s26, 4  ;;  %s1403_s27 = int_to_ptr.vmem [resolvable:$false] %s1402_s27 }
  0x3d   : > { %v206_v5 = vmax.f32 %v204_v3, %v205_v4  ;;  %v220_v14 = vcombine.low %v1609_v9, %v1612_v12  ;;  %p1400_p12 = pnand %p1399_p6, %p2084_p11  ;;  %s1404_s28 = scalar_lea.vmem %s1403_s27, 256 }
  0x3e   : > { %p1405_p7 = scmp.lt.s32.totalorder %s2030_s11, %s1403_s27  ;;  %p1406_p10 = scmp.lt.s32.totalorder %s1404_s28, %s1398_s16 }
  0x3f   : > { %207 = vmax.xlane.f32.xlu0 %v206_v5  ;;  %p1401_p13 = pneg %p1400_p12 }
  0x40   : > { %p1407_p2 = por %p1406_p10, %p1405_p7 }
  0x42   : > { %p1408_p4 = pnand %p1407_p2, %p1401_p13 }
  0xcc   : > { %v1618_v15 = vpop.xlane.xlu0 %207 }
  0xcd   : > { %v217_v16 = vrot.slane %v1618_v15, %v1614_v13 }
  0xcf   : > { %vm219_vm1 = vcmp.eq.f32.partialorder %v200_v1, %v217_v16 }
  0xd0   : > { %v221_v17 = vsel %vm219_vm1, %v220_v14, 256 }
  0xd1   : > { %v222_v18 = vcombine.high %v221_v17, %v221_v17  ;;  %v223_v19 = vsel %vm191_vm0, %v221_v17, 2147483647 }
  0xd3   : > { %v224_v20 = vsel %vm191_vm0, %v222_v18, 2147483647 }
  0xd4   : > { %vm225_vm2 = vcmp.lt.s32.totalorder %v223_v19, %v224_v20 }
  0xd5   : > { %v226_v21 = vsel %vm225_vm2, %v223_v19, %v224_v20 }
  0xd6   : > { %v228_v22 = vshra.s32 %v226_v21, 16  ;;  %v227_v24 = vand.u32 65535, %v226_v21 }
  0xd8   : > { %v230_v23 = vcvt.s32.f32 %v228_v22  ;;  %v229_v26 = vcvt.s32.f32 %v227_v24 }
  0xda   : > { %231 = vmin.xlane.f32.xlu0 %v230_v23 }
 0x167   : > { %v232_v25 = vpop.xlane.xlu0 %231 }
 0x168   : > { %vm233_vm3 = vcmp.eq.f32.partialorder %v230_v23, %v232_v25  ;;  %v238_v28 = vcvt.f32.s32 %v232_v25 }
 0x169   : > { %v234_v27 = vsel %vm233_vm3, %v229_v26, inf }
 0x16a   : > { %235 = vmin.xlane.f32.xlu1 %v234_v27  ;;  %v239_v30 = vshll.u32 %v238_v28, 16 }
 0x1f7   : > { %v236_v29 = vpop.xlane.xlu1 %235 }
 0x1f8   : > { %v237_v31 = vcvt.f32.s32 %v236_v29 }
 0x1fa   : > { %v240_v32 = vadd.s32 %v239_v30, %v237_v31 }
 0x1fc   : > { %vm241_vm4 = vcmp.eq.s32.totalorder %v1609_v9, %v240_v32  ;;  %vm242_vm5 = vcmp.eq.s32.totalorder %v1612_v12, %v240_v32 }
 0x1fd   : > { %v243_v33 = vsel %vm241_vm4, -inf, %v200_v1  ;;  %v244_v34 = vsel %vm242_vm5, -inf, %v202_v2 }
 0x1fe   : > { %v245_v35 = vsel %vm191_vm0, %v243_v33, -inf  ;;  %v246_v36 = vsel %vm191_vm0, %v244_v34, -inf }
 0x1ff   : > { %v247_v37 = vmax.f32 %v245_v35, %v246_v36 }
 0x201   : > { %248 = vmax.xlane.f32.xlu1 %v247_v37 }
 0x28e   : > { %v1628_v38 = vpop.xlane.xlu1 %248 }
 0x28f   : > { %vm251_vm6 = vcmp.eq.f32.partialorder %v243_v33, %v1628_v38  ;;  %vm252_vm7 = vcmp.eq.f32.partialorder %v244_v34, %v1628_v38 }
 0x290   : > { %v253_v39 = vsel %vm251_vm6, %v1609_v9, 256  ;;  %v254_v40 = vsel %vm252_vm7, %v1612_v12, 256 }
 0x291   : > { %v255_v41 = vsel %vm191_vm0, %v253_v39, 2147483647  ;;  %v256_v42 = vsel %vm191_vm0, %v254_v40, 2147483647 }
 0x292   : > { %vm257_vm8 = vcmp.lt.s32.totalorder %v255_v41, %v256_v42 }
 0x293   : > { %v258_v43 = vsel %vm257_vm8, %v255_v41, %v256_v42 }
 0x294   : > { %v260_v44 = vshra.s32 %v258_v43, 16  ;;  %v259_v46 = vand.u32 65535, %v258_v43 }
 0x296   : > { %v262_v45 = vcvt.s32.f32 %v260_v44  ;;  %v261_v48 = vcvt.s32.f32 %v259_v46 }
 0x298   : > { %263 = vmin.xlane.f32.xlu0 %v262_v45 }
 0x325   : > { %v264_v47 = vpop.xlane.xlu0 %263 }
 0x326   : > { %vm265_vm9 = vcmp.eq.f32.partialorder %v262_v45, %v264_v47  ;;  %v270_v50 = vcvt.f32.s32 %v264_v47 }
 0x327   : > { %v266_v49 = vsel %vm265_vm9, %v261_v48, inf }
 0x328   : > { %267 = vmin.xlane.f32.xlu1 %v266_v49  ;;  %v271_v52 = vshll.u32 %v270_v50, 16 }
 0x3b5   : > { %v268_v51 = vpop.xlane.xlu1 %267 }
 0x3b6   : > { %v269_v53 = vcvt.f32.s32 %v268_v51 }
 0x3b8   : > { %v272_v54 = vadd.s32 %v271_v52, %v269_v53 }
 0x3ba   : > { %vm273_vm10 = vcmp.eq.s32.totalorder %v1609_v9, %v272_v54  ;;  %vm274_vm11 = vcmp.eq.s32.totalorder %v1612_v12, %v272_v54 }
 0x3bb   : > { %v275_v55 = vsel %vm273_vm10, -inf, %v243_v33  ;;  %v276_v56 = vsel %vm274_vm11, -inf, %v244_v34 }
 0x3bc   : > { %v277_v57 = vsel %vm191_vm0, %v275_v55, -inf  ;;  %v278_v58 = vsel %vm191_vm0, %v276_v56, -inf }
 0x3bd   : > { %v279_v59 = vmax.f32 %v277_v57, %v278_v58 }
 0x3bf   : > { %280 = vmax.xlane.f32.xlu0 %v279_v59 }
 0x44c   : > { %v1640_v60 = vpop.xlane.xlu0 %280 }
 0x44d   : > { %vm283_vm12 = vcmp.eq.f32.partialorder %v275_v55, %v1640_v60  ;;  %vm284_vm13 = vcmp.eq.f32.partialorder %v276_v56, %v1640_v60 }
 0x44e   : > { %v285_v61 = vsel %vm283_vm12, %v1609_v9, 256  ;;  %v286_v62 = vsel %vm284_vm13, %v1612_v12, 256 }
 0x44f   : > { %v287_v63 = vsel %vm191_vm0, %v285_v61, 2147483647  ;;  %v288_v0 = vsel %vm191_vm0, %v286_v62, 2147483647 }
 0x450   : > { %vm289_vm14 = vcmp.lt.s32.totalorder %v287_v63, %v288_v0 }
 0x451   : > { %v290_v1 = vsel %vm289_vm14, %v287_v63, %v288_v0 }
 0x452   : > { %v292_v2 = vshra.s32 %v290_v1, 16  ;;  %v291_v4 = vand.u32 65535, %v290_v1 }
 0x454   : > { %v294_v3 = vcvt.s32.f32 %v292_v2  ;;  %v293_v6 = vcvt.s32.f32 %v291_v4 }
 0x456   : > { %295 = vmin.xlane.f32.xlu1 %v294_v3 }
 0x4e3   : > { %v296_v5 = vpop.xlane.xlu1 %295 }
 0x4e4   : > { %vm297_vm15 = vcmp.eq.f32.partialorder %v294_v3, %v296_v5  ;;  %v302_v8 = vcvt.f32.s32 %v296_v5 }
 0x4e5   : > { %v298_v7 = vsel %vm297_vm15, %v293_v6, inf }
 0x4e6   : > { %299 = vmin.xlane.f32.xlu0 %v298_v7  ;;  %v303_v11 = vshll.u32 %v302_v8, 16 }
 0x573   : > { %v300_v10 = vpop.xlane.xlu0 %299 }
 0x574   : > { %v301_v14 = vcvt.f32.s32 %v300_v10 }
 0x576   : > { %v304_v16 = vadd.s32 %v303_v11, %v301_v14 }
 0x578   : > { %vm305_vm1 = vcmp.eq.s32.totalorder %v1609_v9, %v304_v16  ;;  %vm306_vm2 = vcmp.eq.s32.totalorder %v1612_v12, %v304_v16 }
 0x579   : > { %v307_v17 = vsel %vm305_vm1, -inf, %v275_v55  ;;  %v308_v18 = vsel %vm306_vm2, -inf, %v276_v56 }
 0x57a   : > { %v309_v19 = vsel %vm191_vm0, %v307_v17, -inf  ;;  %v310_v20 = vsel %vm191_vm0, %v308_v18, -inf }
 0x57b   : > { %v311_v21 = vmax.f32 %v309_v19, %v310_v20 }
 0x57d   : > { %312 = vmax.xlane.f32.xlu1 %v311_v21 }
 0x60a   : > { %v1652_v22 = vpop.xlane.xlu1 %312 }
 0x60b   : > { %vm315_vm3 = vcmp.eq.f32.partialorder %v307_v17, %v1652_v22  ;;  %vm316_vm4 = vcmp.eq.f32.partialorder %v308_v18, %v1652_v22 }
 0x60c   : > { %v317_v23 = vsel %vm315_vm3, %v1609_v9, 256  ;;  %v318_v24 = vsel %vm316_vm4, %v1612_v12, 256 }
 0x60d   : > { %v319_v25 = vsel %vm191_vm0, %v317_v23, 2147483647  ;;  %v320_v26 = vsel %vm191_vm0, %v318_v24, 2147483647 }
 0x60e   : > { %vm321_vm5 = vcmp.lt.s32.totalorder %v319_v25, %v320_v26 }
 0x60f   : > { %v322_v27 = vsel %vm321_vm5, %v319_v25, %v320_v26 }
 0x610   : > { %v324_v28 = vshra.s32 %v322_v27, 16  ;;  %v323_v30 = vand.u32 65535, %v322_v27 }
 0x612   : > { %v326_v29 = vcvt.s32.f32 %v324_v28  ;;  %v325_v32 = vcvt.s32.f32 %v323_v30 }
 0x614   : > { %327 = vmin.xlane.f32.xlu0 %v326_v29 }
 0x6a1   : > { %v328_v31 = vpop.xlane.xlu0 %327 }
 0x6a2   : > { %vm329_vm6 = vcmp.eq.f32.partialorder %v326_v29, %v328_v31  ;;  %v334_v34 = vcvt.f32.s32 %v328_v31 }
 0x6a3   : > { %v330_v33 = vsel %vm329_vm6, %v325_v32, inf }
 0x6a4   : > { %331 = vmin.xlane.f32.xlu1 %v330_v33  ;;  %v335_v36 = vshll.u32 %v334_v34, 16 }
 0x731   : > { %v332_v35 = vpop.xlane.xlu1 %331 }
 0x732   : > { %v333_v37 = vcvt.f32.s32 %v332_v35 }
 0x734   : > { %v336_v39 = vadd.s32 %v335_v36, %v333_v37 }
 0x736   : > { %vm337_vm7 = vcmp.eq.s32.totalorder %v1609_v9, %v336_v39  ;;  %vm338_vm8 = vcmp.eq.s32.totalorder %v1612_v12, %v336_v39 }
 0x737   : > { %v339_v40 = vsel %vm337_vm7, -inf, %v307_v17  ;;  %v340_v41 = vsel %vm338_vm8, -inf, %v308_v18 }
 0x738   : > { %v341_v42 = vsel %vm191_vm0, %v339_v40, -inf  ;;  %v342_v43 = vsel %vm191_vm0, %v340_v41, -inf }
 0x739   : > { %v343_v44 = vmax.f32 %v341_v42, %v342_v43 }
 0x73b   : > { %344 = vmax.xlane.f32.xlu0 %v343_v44 }
 0x7c8   : > { %v1664_v45 = vpop.xlane.xlu0 %344 }
 0x7c9   : > { %vm347_vm9 = vcmp.eq.f32.partialorder %v339_v40, %v1664_v45  ;;  %vm348_vm10 = vcmp.eq.f32.partialorder %v340_v41, %v1664_v45 }
 0x7ca   : > { %v349_v46 = vsel %vm347_vm9, %v1609_v9, 256  ;;  %v350_v47 = vsel %vm348_vm10, %v1612_v12, 256 }
 0x7cb   : > { %v351_v48 = vsel %vm191_vm0, %v349_v46, 2147483647  ;;  %v352_v49 = vsel %vm191_vm0, %v350_v47, 2147483647 }
 0x7cc   : > { %vm353_vm11 = vcmp.lt.s32.totalorder %v351_v48, %v352_v49 }
 0x7cd   : > { %v354_v50 = vsel %vm353_vm11, %v351_v48, %v352_v49 }
 0x7ce   : > { %v356_v51 = vshra.s32 %v354_v50, 16  ;;  %v355_v53 = vand.u32 65535, %v354_v50 }
 0x7d0   : > { %v358_v52 = vcvt.s32.f32 %v356_v51  ;;  %v357_v55 = vcvt.s32.f32 %v355_v53 }
 0x7d2   : > { %359 = vmin.xlane.f32.xlu1 %v358_v52 }
 0x85f   : > { %v360_v54 = vpop.xlane.xlu1 %359 }
 0x860   : > { %vm361_vm12 = vcmp.eq.f32.partialorder %v358_v52, %v360_v54  ;;  %v366_v57 = vcvt.f32.s32 %v360_v54 }
 0x861   : > { %v362_v56 = vsel %vm361_vm12, %v357_v55, inf }
 0x862   : > { %363 = vmin.xlane.f32.xlu0 %v362_v56  ;;  %v367_v59 = vshll.u32 %v366_v57, 16 }
 0x8ef   : > { %v364_v58 = vpop.xlane.xlu0 %363 }
 0x8f0   : > { %v365_v61 = vcvt.f32.s32 %v364_v58 }
 0x8f2   : > { %v368_v62 = vadd.s32 %v367_v59, %v365_v61 }
 0x8f4   : > { %vm369_vm13 = vcmp.eq.s32.totalorder %v1609_v9, %v368_v62  ;;  %vm370_vm14 = vcmp.eq.s32.totalorder %v1612_v12, %v368_v62 }
 0x8f5   : > { %v371_v63 = vsel %vm369_vm13, -inf, %v339_v40  ;;  %v372_v0 = vsel %vm370_vm14, -inf, %v340_v41 }
 0x8f6   : > { %v373_v1 = vsel %vm191_vm0, %v371_v63, -inf  ;;  %v374_v2 = vsel %vm191_vm0, %v372_v0, -inf }
 0x8f7   : > { %v375_v3 = vmax.f32 %v373_v1, %v374_v2 }
 0x8f9   : > { %376 = vmax.xlane.f32.xlu1 %v375_v3 }
 0x986   : > { %v1676_v4 = vpop.xlane.xlu1 %376 }
 0x987   : > { %vm379_vm15 = vcmp.eq.f32.partialorder %v371_v63, %v1676_v4  ;;  %vm380_vm1 = vcmp.eq.f32.partialorder %v372_v0, %v1676_v4 }
 0x988   : > { %v381_v5 = vsel %vm379_vm15, %v1609_v9, 256  ;;  %v382_v6 = vsel %vm380_vm1, %v1612_v12, 256 }
 0x989   : > { %v383_v7 = vsel %vm191_vm0, %v381_v5, 2147483647  ;;  %v384_v8 = vsel %vm191_vm0, %v382_v6, 2147483647 }
 0x98a   : > { %vm385_vm2 = vcmp.lt.s32.totalorder %v383_v7, %v384_v8 }
 0x98b   : > { %v386_v10 = vsel %vm385_vm2, %v383_v7, %v384_v8 }
 0x98c   : > { %v388_v11 = vshra.s32 %v386_v10, 16  ;;  %v387_v16 = vand.u32 65535, %v386_v10 }
 0x98e   : > { %v390_v14 = vcvt.s32.f32 %v388_v11  ;;  %v389_v18 = vcvt.s32.f32 %v387_v16 }
 0x990   : > { %391 = vmin.xlane.f32.xlu0 %v390_v14 }
 0xa1d   : > { %v392_v17 = vpop.xlane.xlu0 %391 }
 0xa1e   : > { %vm393_vm3 = vcmp.eq.f32.partialorder %v390_v14, %v392_v17  ;;  %v398_v20 = vcvt.f32.s32 %v392_v17 }
 0xa1f   : > { %v394_v19 = vsel %vm393_vm3, %v389_v18, inf }
 0xa20   : > { %395 = vmin.xlane.f32.xlu1 %v394_v19  ;;  %v399_v23 = vshll.u32 %v398_v20, 16 }
 0xaad   : > { %v396_v21 = vpop.xlane.xlu1 %395 }
 0xaae   : > { %v397_v24 = vcvt.f32.s32 %v396_v21 }
 0xab0   : > { %v400_v25 = vadd.s32 %v399_v23, %v397_v24 }
 0xab2   : > { %vm401_vm4 = vcmp.eq.s32.totalorder %v1609_v9, %v400_v25  ;;  %vm402_vm5 = vcmp.eq.s32.totalorder %v1612_v12, %v400_v25 }
 0xab3   : > { %v403_v26 = vsel %vm401_vm4, -inf, %v371_v63  ;;  %v404_v27 = vsel %vm402_vm5, -inf, %v372_v0 }
 0xab4   : > { %v405_v28 = vsel %vm191_vm0, %v403_v26, -inf  ;;  %v406_v29 = vsel %vm191_vm0, %v404_v27, -inf }
 0xab5   : > { %v407_v30 = vmax.f32 %v405_v28, %v406_v29 }
 0xab7   : > { %408 = vmax.xlane.f32.xlu0 %v407_v30 }
 0xb44   : > { %v1688_v31 = vpop.xlane.xlu0 %408 }
 0xb45   : > { %vm411_vm6 = vcmp.eq.f32.partialorder %v403_v26, %v1688_v31  ;;  %vm412_vm7 = vcmp.eq.f32.partialorder %v404_v27, %v1688_v31 }
 0xb46   : > { %v413_v32 = vsel %vm411_vm6, %v1609_v9, 256  ;;  %v414_v33 = vsel %vm412_vm7, %v1612_v12, 256 }
 0xb47   : > { %v415_v34 = vsel %vm191_vm0, %v413_v32, 2147483647  ;;  %v416_v35 = vsel %vm191_vm0, %v414_v33, 2147483647 }
 0xb48   : > { %vm417_vm8 = vcmp.lt.s32.totalorder %v415_v34, %v416_v35 }
 0xb49   : > { %v418_v36 = vsel %vm417_vm8, %v415_v34, %v416_v35 }
 0xb4a   : > { %v420_v37 = vshra.s32 %v418_v36, 16  ;;  %v419_v40 = vand.u32 65535, %v418_v36 }
 0xb4c   : > { %v422_v39 = vcvt.s32.f32 %v420_v37  ;;  %v421_v42 = vcvt.s32.f32 %v419_v40 }
 0xb4e   : > { %423 = vmin.xlane.f32.xlu1 %v422_v39 }
 0xbdb   : > { %v424_v41 = vpop.xlane.xlu1 %423 }
 0xbdc   : > { %vm425_vm9 = vcmp.eq.f32.partialorder %v422_v39, %v424_v41  ;;  %v430_v44 = vcvt.f32.s32 %v424_v41 }
 0xbdd   : > { %v426_v43 = vsel %vm425_vm9, %v421_v42, inf }
 0xbde   : > { %427 = vmin.xlane.f32.xlu0 %v426_v43  ;;  %v431_v47 = vshll.u32 %v430_v44, 16 }
 0xc6b   : > { %v428_v46 = vpop.xlane.xlu0 %427 }
 0xc6c   : > { %v429_v48 = vcvt.f32.s32 %v428_v46 }
 0xc6e   : > { %v432_v49 = vadd.s32 %v431_v47, %v429_v48 }
 0xc70   : > { %vm433_vm10 = vcmp.eq.s32.totalorder %v1609_v9, %v432_v49  ;;  %vm434_vm11 = vcmp.eq.s32.totalorder %v1612_v12, %v432_v49 }
 0xc71   : > { %v435_v50 = vsel %vm433_vm10, -inf, %v403_v26  ;;  %v436_v51 = vsel %vm434_vm11, -inf, %v404_v27 }
 0xc72   : > { %v437_v52 = vsel %vm191_vm0, %v435_v50, -inf  ;;  %v438_v53 = vsel %vm191_vm0, %v436_v51, -inf }
 0xc73   : > { %v439_v54 = vmax.f32 %v437_v52, %v438_v53 }
 0xc75   : > { %440 = vmax.xlane.f32.xlu1 %v439_v54 }
 0xd02   : > { %v1700_v55 = vpop.xlane.xlu1 %440 }
 0xd03   : > { %vm443_vm12 = vcmp.eq.f32.partialorder %v435_v50, %v1700_v55  ;;  %vm444_vm13 = vcmp.eq.f32.partialorder %v436_v51, %v1700_v55 }
 0xd04   : > { %v445_v56 = vsel %vm443_vm12, %v1609_v9, 256  ;;  %v446_v57 = vsel %vm444_vm13, %v1612_v12, 256 }
 0xd05   : > { %v447_v58 = vsel %vm191_vm0, %v445_v56, 2147483647  ;;  %v448_v59 = vsel %vm191_vm0, %v446_v57, 2147483647 }
 0xd06   : > { %vm449_vm14 = vcmp.lt.s32.totalorder %v447_v58, %v448_v59 }
 0xd07   : > { %v450_v61 = vsel %vm449_vm14, %v447_v58, %v448_v59 }
 0xd08   : > { %v452_v62 = vshra.s32 %v450_v61, 16  ;;  %v451_v0 = vand.u32 65535, %v450_v61 }
 0xd0a   : > { %v454_v63 = vcvt.s32.f32 %v452_v62  ;;  %v453_v2 = vcvt.s32.f32 %v451_v0 }
 0xd0c   : > { %455 = vmin.xlane.f32.xlu0 %v454_v63 }
 0xd99   : > { %v456_v1 = vpop.xlane.xlu0 %455 }
 0xd9a   : > { %vm457_vm15 = vcmp.eq.f32.partialorder %v454_v63, %v456_v1  ;;  %v462_v5 = vcvt.f32.s32 %v456_v1 }
 0xd9b   : > { %v458_v3 = vsel %vm457_vm15, %v453_v2, inf }
 0xd9c   : > { %459 = vmin.xlane.f32.xlu1 %v458_v3  ;;  %v463_v7 = vshll.u32 %v462_v5, 16 }
 0xe29   : > { %v460_v6 = vpop.xlane.xlu1 %459 }
 0xe2a   : > { %v461_v8 = vcvt.f32.s32 %v460_v6 }
 0xe2c   : > { %v464_v10 = vadd.s32 %v463_v7, %v461_v8 }
 0xe2e   : > { %vm465_vm1 = vcmp.eq.s32.totalorder %v1609_v9, %v464_v10  ;;  %vm466_vm2 = vcmp.eq.s32.totalorder %v1612_v12, %v464_v10 }
 0xe2f   : > { %v467_v11 = vsel %vm465_vm1, -inf, %v435_v50  ;;  %v468_v14 = vsel %vm466_vm2, -inf, %v436_v51 }
 0xe30   : > { %v469_v16 = vsel %vm191_vm0, %v467_v11, -inf  ;;  %v470_v17 = vsel %vm191_vm0, %v468_v14, -inf }
 0xe31   : > { %v471_v18 = vmax.f32 %v469_v16, %v470_v17 }
 0xe33   : > { %472 = vmax.xlane.f32.xlu0 %v471_v18 }
 0xec0   : > { %v1712_v19 = vpop.xlane.xlu0 %472 }
 0xec1   : > { %vm475_vm3 = vcmp.eq.f32.partialorder %v467_v11, %v1712_v19  ;;  %vm476_vm4 = vcmp.eq.f32.partialorder %v468_v14, %v1712_v19 }
 0xec2   : > { %v477_v20 = vsel %vm475_vm3, %v1609_v9, 256  ;;  %v478_v21 = vsel %vm476_vm4, %v1612_v12, 256 }
 0xec3   : > { %v479_v23 = vsel %vm191_vm0, %v477_v20, 2147483647  ;;  %v480_v24 = vsel %vm191_vm0, %v478_v21, 2147483647 }
 0xec4   : > { %vm481_vm5 = vcmp.lt.s32.totalorder %v479_v23, %v480_v24 }
 0xec5   : > { %v482_v25 = vsel %vm481_vm5, %v479_v23, %v480_v24 }
 0xec6   : > { %v484_v26 = vshra.s32 %v482_v25, 16  ;;  %v483_v28 = vand.u32 65535, %v482_v25 }
 0xec8   : > { %v486_v27 = vcvt.s32.f32 %v484_v26  ;;  %v485_v30 = vcvt.s32.f32 %v483_v28 }
 0xeca   : > { %487 = vmin.xlane.f32.xlu1 %v486_v27 }
 0xf57   : > { %v488_v29 = vpop.xlane.xlu1 %487 }
 0xf58   : > { %vm489_vm6 = vcmp.eq.f32.partialorder %v486_v27, %v488_v29  ;;  %v494_v33 = vcvt.f32.s32 %v488_v29 }
 0xf59   : > { %v490_v32 = vsel %vm489_vm6, %v485_v30, inf }
 0xf5a   : > { %491 = vmin.xlane.f32.xlu0 %v490_v32  ;;  %v495_v35 = vshll.u32 %v494_v33, 16 }
 0xfe7   : > { %v492_v34 = vpop.xlane.xlu0 %491 }
 0xfe8   : > { %v493_v36 = vcvt.f32.s32 %v492_v34 }
 0xfea   : > { %v496_v37 = vadd.s32 %v495_v35, %v493_v36 }
 0xfec   : > { %vm497_vm7 = vcmp.eq.s32.totalorder %v1609_v9, %v496_v37  ;;  %vm498_vm8 = vcmp.eq.s32.totalorder %v1612_v12, %v496_v37 }
 0xfed   : > { %v499_v39 = vsel %vm497_vm7, -inf, %v467_v11  ;;  %v500_v40 = vsel %vm498_vm8, -inf, %v468_v14 }
 0xfee   : > { %v501_v41 = vsel %vm191_vm0, %v499_v39, -inf  ;;  %v502_v42 = vsel %vm191_vm0, %v500_v40, -inf }
 0xfef   : > { %v503_v43 = vmax.f32 %v501_v41, %v502_v42 }
 0xff1   : > { %504 = vmax.xlane.f32.xlu1 %v503_v43 }
0x107e   : > { %v1724_v44 = vpop.xlane.xlu1 %504 }
0x107f   : > { %vm507_vm9 = vcmp.eq.f32.partialorder %v499_v39, %v1724_v44  ;;  %vm508_vm10 = vcmp.eq.f32.partialorder %v500_v40, %v1724_v44 }
0x1080   : > { %v509_v46 = vsel %vm507_vm9, %v1609_v9, 256  ;;  %v510_v47 = vsel %vm508_vm10, %v1612_v12, 256 }
0x1081   : > { %v511_v48 = vsel %vm191_vm0, %v509_v46, 2147483647  ;;  %v512_v49 = vsel %vm191_vm0, %v510_v47, 2147483647 }
0x1082   : > { %vm513_vm11 = vcmp.lt.s32.totalorder %v511_v48, %v512_v49 }
0x1083   : > { %v514_v50 = vsel %vm513_vm11, %v511_v48, %v512_v49 }
0x1084   : > { %v516_v51 = vshra.s32 %v514_v50, 16  ;;  %v515_v53 = vand.u32 65535, %v514_v50 }
0x1086   : > { %v518_v52 = vcvt.s32.f32 %v516_v51  ;;  %v517_v56 = vcvt.s32.f32 %v515_v53 }
0x1088   : > { %519 = vmin.xlane.f32.xlu0 %v518_v52 }
0x1115   : > { %v520_v54 = vpop.xlane.xlu0 %519 }
0x1116   : > { %vm521_vm12 = vcmp.eq.f32.partialorder %v518_v52, %v520_v54  ;;  %v526_v58 = vcvt.f32.s32 %v520_v54 }
0x1117   : > { %v522_v57 = vsel %vm521_vm12, %v517_v56, inf }
0x1118   : > { %523 = vmin.xlane.f32.xlu1 %v522_v57  ;;  %v527_v61 = vshll.u32 %v526_v58, 16 }
0x11a5   : > { %v524_v59 = vpop.xlane.xlu1 %523 }
0x11a6   : > { %v525_v62 = vcvt.f32.s32 %v524_v59 }
0x11a8   : > { %v528_v63 = vadd.s32 %v527_v61, %v525_v62 }
0x11aa   : > { %vm529_vm13 = vcmp.eq.s32.totalorder %v1609_v9, %v528_v63  ;;  %vm530_vm14 = vcmp.eq.s32.totalorder %v1612_v12, %v528_v63 }
0x11ab   : > { %v531_v0 = vsel %vm529_vm13, -inf, %v499_v39  ;;  %v532_v1 = vsel %vm530_vm14, -inf, %v500_v40 }
0x11ac   : > { %v533_v2 = vsel %vm191_vm0, %v531_v0, -inf  ;;  %v534_v3 = vsel %vm191_vm0, %v532_v1, -inf }
0x11ad   : > { %v535_v5 = vmax.f32 %v533_v2, %v534_v3 }
0x11af   : > { %536 = vmax.xlane.f32.xlu0 %v535_v5 }
0x123c   : > { %v1736_v6 = vpop.xlane.xlu0 %536 }
0x123d   : > { %vm539_vm15 = vcmp.eq.f32.partialorder %v531_v0, %v1736_v6  ;;  %vm540_vm1 = vcmp.eq.f32.partialorder %v532_v1, %v1736_v6 }
0x123e   : > { %v541_v7 = vsel %vm539_vm15, %v1609_v9, 256  ;;  %v542_v8 = vsel %vm540_vm1, %v1612_v12, 256 }
0x123f   : > { %v543_v10 = vsel %vm191_vm0, %v541_v7, 2147483647  ;;  %v544_v11 = vsel %vm191_vm0, %v542_v8, 2147483647 }
0x1240   : > { %vm545_vm2 = vcmp.lt.s32.totalorder %v543_v10, %v544_v11 }
0x1241   : > { %v546_v14 = vsel %vm545_vm2, %v543_v10, %v544_v11 }
0x1242   : > { %v548_v16 = vshra.s32 %v546_v14, 16  ;;  %v547_v18 = vand.u32 65535, %v546_v14 }
0x1244   : > { %v550_v17 = vcvt.s32.f32 %v548_v16  ;;  %v549_v21 = vcvt.s32.f32 %v547_v18 }
0x1246   : > { %551 = vmin.xlane.f32.xlu1 %v550_v17 }
0x12d3   : > { %v552_v20 = vpop.xlane.xlu1 %551 }
0x12d4   : > { %vm553_vm3 = vcmp.eq.f32.partialorder %v550_v17, %v552_v20  ;;  %v558_v24 = vcvt.f32.s32 %v552_v20 }
0x12d5   : > { %v554_v23 = vsel %vm553_vm3, %v549_v21, inf }
0x12d6   : > { %555 = vmin.xlane.f32.xlu0 %v554_v23  ;;  %v559_v26 = vshll.u32 %v558_v24, 16 }
0x1363   : > { %v556_v25 = vpop.xlane.xlu0 %555 }
0x1364   : > { %v557_v27 = vcvt.f32.s32 %v556_v25 }
0x1366   : > { %v560_v28 = vadd.s32 %v559_v26, %v557_v27 }
0x1368   : > { %vm561_vm4 = vcmp.eq.s32.totalorder %v1609_v9, %v560_v28  ;;  %vm562_vm5 = vcmp.eq.s32.totalorder %v1612_v12, %v560_v28 }
0x1369   : > { %v563_v29 = vsel %vm561_vm4, -inf, %v531_v0  ;;  %v564_v30 = vsel %vm562_vm5, -inf, %v532_v1 }
0x136a   : > { %v565_v32 = vsel %vm191_vm0, %v563_v29, -inf  ;;  %v566_v33 = vsel %vm191_vm0, %v564_v30, -inf }
0x136b   : > { %v567_v34 = vmax.f32 %v565_v32, %v566_v33 }
0x136d   : > { %568 = vmax.xlane.f32.xlu1 %v567_v34 }
0x13fa   : > { %v1748_v35 = vpop.xlane.xlu1 %568 }
0x13fb   : > { %vm571_vm6 = vcmp.eq.f32.partialorder %v563_v29, %v1748_v35  ;;  %vm572_vm7 = vcmp.eq.f32.partialorder %v564_v30, %v1748_v35 }
0x13fc   : > { %v573_v36 = vsel %vm571_vm6, %v1609_v9, 256  ;;  %v574_v37 = vsel %vm572_vm7, %v1612_v12, 256 }
0x13fd   : > { %v575_v39 = vsel %vm191_vm0, %v573_v36, 2147483647  ;;  %v576_v40 = vsel %vm191_vm0, %v574_v37, 2147483647 }
0x13fe   : > { %vm577_vm8 = vcmp.lt.s32.totalorder %v575_v39, %v576_v40 }
0x13ff   : > { %v578_v41 = vsel %vm577_vm8, %v575_v39, %v576_v40 }
0x1400   : > { %v580_v42 = vshra.s32 %v578_v41, 16  ;;  %v579_v46 = vand.u32 65535, %v578_v41 }
0x1402   : > { %v582_v43 = vcvt.s32.f32 %v580_v42  ;;  %v581_v48 = vcvt.s32.f32 %v579_v46 }
0x1404   : > { %583 = vmin.xlane.f32.xlu0 %v582_v43 }
0x1491   : > { %v584_v47 = vpop.xlane.xlu0 %583 }
0x1492   : > { %vm585_vm9 = vcmp.eq.f32.partialorder %v582_v43, %v584_v47  ;;  %v590_v50 = vcvt.f32.s32 %v584_v47 }
0x1493   : > { %v586_v49 = vsel %vm585_vm9, %v581_v48, inf }
0x1494   : > { %587 = vmin.xlane.f32.xlu1 %v586_v49  ;;  %v591_v52 = vshll.u32 %v590_v50, 16 }
0x1521   : > { %v588_v51 = vpop.xlane.xlu1 %587 }
0x1522   : > { %v589_v53 = vcvt.f32.s32 %v588_v51 }
0x1524   : > { %v592_v54 = vadd.s32 %v591_v52, %v589_v53 }
0x1526   : > { %vm593_vm10 = vcmp.eq.s32.totalorder %v1609_v9, %v592_v54  ;;  %vm594_vm11 = vcmp.eq.s32.totalorder %v1612_v12, %v592_v54 }
0x1527   : > { %v595_v56 = vsel %vm593_vm10, -inf, %v563_v29  ;;  %v596_v57 = vsel %vm594_vm11, -inf, %v564_v30 }
0x1528   : > { %v597_v58 = vsel %vm191_vm0, %v595_v56, -inf  ;;  %v598_v59 = vsel %vm191_vm0, %v596_v57, -inf }
0x1529   : > { %v599_v61 = vmax.f32 %v597_v58, %v598_v59 }
0x152b   : > { %600 = vmax.xlane.f32.xlu0 %v599_v61 }
0x15b8   : > { %v1760_v62 = vpop.xlane.xlu0 %600 }
0x15b9   : > { %vm603_vm12 = vcmp.eq.f32.partialorder %v595_v56, %v1760_v62  ;;  %vm604_vm13 = vcmp.eq.f32.partialorder %v596_v57, %v1760_v62 }
0x15ba   : > { %v605_v63 = vsel %vm603_vm12, %v1609_v9, 256  ;;  %v606_v0 = vsel %vm604_vm13, %v1612_v12, 256 }
0x15bb   : > { %v607_v1 = vsel %vm191_vm0, %v605_v63, 2147483647  ;;  %v608_v2 = vsel %vm191_vm0, %v606_v0, 2147483647 }
0x15bc   : > { %vm609_vm14 = vcmp.lt.s32.totalorder %v607_v1, %v608_v2 }
0x15bd   : > { %v610_v3 = vsel %vm609_vm14, %v607_v1, %v608_v2 }
0x15be   : > { %v612_v5 = vshra.s32 %v610_v3, 16  ;;  %v611_v8 = vand.u32 65535, %v610_v3 }
0x15c0   : > { %v614_v7 = vcvt.s32.f32 %v612_v5  ;;  %v613_v11 = vcvt.s32.f32 %v611_v8 }
0x15c2   : > { %615 = vmin.xlane.f32.xlu1 %v614_v7 }
0x164f   : > { %v616_v10 = vpop.xlane.xlu1 %615 }
0x1650   : > { %vm617_vm15 = vcmp.eq.f32.partialorder %v614_v7, %v616_v10  ;;  %v622_v16 = vcvt.f32.s32 %v616_v10 }
0x1651   : > { %v618_v14 = vsel %vm617_vm15, %v613_v11, inf }
0x1652   : > { %619 = vmin.xlane.f32.xlu0 %v618_v14  ;;  %v623_v18 = vshll.u32 %v622_v16, 16 }
0x16df   : > { %v620_v17 = vpop.xlane.xlu0 %619 }
0x16e0   : > { %v621_v20 = vcvt.f32.s32 %v620_v17 }
0x16e2   : > { %v624_v21 = vadd.s32 %v623_v18, %v621_v20 }
0x16e4   : > { %vm625_vm1 = vcmp.eq.s32.totalorder %v1609_v9, %v624_v21  ;;  %vm626_vm2 = vcmp.eq.s32.totalorder %v1612_v12, %v624_v21 }
0x16e5   : > { %v627_v23 = vsel %vm625_vm1, -inf, %v595_v56  ;;  %v628_v24 = vsel %vm626_vm2, -inf, %v596_v57 }
0x16e6   : > { %v629_v25 = vsel %vm191_vm0, %v627_v23, -inf  ;;  %v630_v26 = vsel %vm191_vm0, %v628_v24, -inf }
0x16e7   : > { %v631_v27 = vmax.f32 %v629_v25, %v630_v26 }
0x16e9   : > { %632 = vmax.xlane.f32.xlu1 %v631_v27 }
0x1776   : > { %v1772_v28 = vpop.xlane.xlu1 %632 }
0x1777   : > { %vm635_vm3 = vcmp.eq.f32.partialorder %v627_v23, %v1772_v28  ;;  %vm636_vm4 = vcmp.eq.f32.partialorder %v628_v24, %v1772_v28 }
0x1778   : > { %v637_v29 = vsel %vm635_vm3, %v1609_v9, 256  ;;  %v638_v30 = vsel %vm636_vm4, %v1612_v12, 256 }
0x1779   : > { %v639_v32 = vsel %vm191_vm0, %v637_v29, 2147483647  ;;  %v640_v33 = vsel %vm191_vm0, %v638_v30, 2147483647 }
0x177a   : > { %vm641_vm5 = vcmp.lt.s32.totalorder %v639_v32, %v640_v33 }
0x177b   : > { %v642_v34 = vsel %vm641_vm5, %v639_v32, %v640_v33 }
0x177c   : > { %v644_v36 = vshra.s32 %v642_v34, 16  ;;  %v643_v39 = vand.u32 65535, %v642_v34 }
0x177e   : > { %v646_v37 = vcvt.s32.f32 %v644_v36  ;;  %v645_v41 = vcvt.s32.f32 %v643_v39 }
0x1780   : > { %647 = vmin.xlane.f32.xlu0 %v646_v37 }
0x180d   : > { %v648_v40 = vpop.xlane.xlu0 %647 }
0x180e   : > { %vm649_vm6 = vcmp.eq.f32.partialorder %v646_v37, %v648_v40  ;;  %v654_v43 = vcvt.f32.s32 %v648_v40 }
0x180f   : > { %v650_v42 = vsel %vm649_vm6, %v645_v41, inf }
0x1810   : > { %651 = vmin.xlane.f32.xlu1 %v650_v42  ;;  %v655_v47 = vshll.u32 %v654_v43, 16 }
0x189d   : > { %v652_v46 = vpop.xlane.xlu1 %651 }
0x189e   : > { %v653_v48 = vcvt.f32.s32 %v652_v46 }
0x18a0   : > { %v656_v49 = vadd.s32 %v655_v47, %v653_v48 }
0x18a2   : > { %vm657_vm7 = vcmp.eq.s32.totalorder %v1609_v9, %v656_v49  ;;  %vm658_vm8 = vcmp.eq.s32.totalorder %v1612_v12, %v656_v49 }
0x18a3   : > { %v659_v50 = vsel %vm657_vm7, -inf, %v627_v23  ;;  %v660_v51 = vsel %vm658_vm8, -inf, %v628_v24 }
0x18a4   : > { %v661_v52 = vsel %vm191_vm0, %v659_v50, -inf  ;;  %v662_v53 = vsel %vm191_vm0, %v660_v51, -inf }
0x18a5   : > { %v663_v54 = vmax.f32 %v661_v52, %v662_v53 }
0x18a7   : > { %664 = vmax.xlane.f32.xlu0 %v663_v54 }
0x1934   : > { %v1784_v56 = vpop.xlane.xlu0 %664 }
0x1935   : > { %vm667_vm9 = vcmp.eq.f32.partialorder %v659_v50, %v1784_v56  ;;  %vm668_vm10 = vcmp.eq.f32.partialorder %v660_v51, %v1784_v56 }
0x1936   : > { %v669_v57 = vsel %vm667_vm9, %v1609_v9, 256  ;;  %v670_v58 = vsel %vm668_vm10, %v1612_v12, 256 }
0x1937   : > { %v671_v59 = vsel %vm191_vm0, %v669_v57, 2147483647  ;;  %v672_v61 = vsel %vm191_vm0, %v670_v58, 2147483647 }
0x1938   : > { %vm673_vm11 = vcmp.lt.s32.totalorder %v671_v59, %v672_v61 }
0x1939   : > { %v674_v63 = vsel %vm673_vm11, %v671_v59, %v672_v61 }
0x193a   : > { %v676_v0 = vshra.s32 %v674_v63, 16  ;;  %v675_v2 = vand.u32 65535, %v674_v63 }
0x193c   : > { %v678_v1 = vcvt.s32.f32 %v676_v0  ;;  %v677_v5 = vcvt.s32.f32 %v675_v2 }
0x193e   : > { %679 = vmin.xlane.f32.xlu1 %v678_v1 }
0x19cb   : > { %v680_v3 = vpop.xlane.xlu1 %679 }
0x19cc   : > { %vm681_vm12 = vcmp.eq.f32.partialorder %v678_v1, %v680_v3  ;;  %v686_v8 = vcvt.f32.s32 %v680_v3 }
0x19cd   : > { %v682_v7 = vsel %vm681_vm12, %v677_v5, inf }
0x19ce   : > { %683 = vmin.xlane.f32.xlu0 %v682_v7  ;;  %v687_v11 = vshll.u32 %v686_v8, 16 }
0x1a5b   : > { %v684_v10 = vpop.xlane.xlu0 %683 }
0x1a5c   : > { %v685_v14 = vcvt.f32.s32 %v684_v10 }
0x1a5e   : > { %v688_v16 = vadd.s32 %v687_v11, %v685_v14 }
0x1a60   : > { %vm689_vm13 = vcmp.eq.s32.totalorder %v1609_v9, %v688_v16  ;;  %vm690_vm14 = vcmp.eq.s32.totalorder %v1612_v12, %v688_v16 }
0x1a61   : > { %v691_v17 = vsel %vm689_vm13, -inf, %v659_v50  ;;  %v692_v18 = vsel %vm690_vm14, -inf, %v660_v51 }
0x1a62   : > { %v693_v20 = vsel %vm191_vm0, %v691_v17, -inf  ;;  %v694_v21 = vsel %vm191_vm0, %v692_v18, -inf }
0x1a63   : > { %v695_v23 = vmax.f32 %v693_v20, %v694_v21 }
0x1a65   : > { %696 = vmax.xlane.f32.xlu1 %v695_v23 }
0x1af2   : > { %v1796_v24 = vpop.xlane.xlu1 %696 }
0x1af3   : > { %vm699_vm15 = vcmp.eq.f32.partialorder %v691_v17, %v1796_v24  ;;  %vm700_vm1 = vcmp.eq.f32.partialorder %v692_v18, %v1796_v24 }
0x1af4   : > { %v701_v25 = vsel %vm699_vm15, %v1609_v9, 256  ;;  %v702_v26 = vsel %vm700_vm1, %v1612_v12, 256 }
0x1af5   : > { %v703_v27 = vsel %vm191_vm0, %v701_v25, 2147483647  ;;  %v704_v29 = vsel %vm191_vm0, %v702_v26, 2147483647 }
0x1af6   : > { %vm705_vm2 = vcmp.lt.s32.totalorder %v703_v27, %v704_v29 }
0x1af7   : > { %v706_v30 = vsel %vm705_vm2, %v703_v27, %v704_v29 }
0x1af8   : > { %v708_v32 = vshra.s32 %v706_v30, 16  ;;  %v707_v34 = vand.u32 65535, %v706_v30 }
0x1afa   : > { %v710_v33 = vcvt.s32.f32 %v708_v32  ;;  %v709_v37 = vcvt.s32.f32 %v707_v34 }
0x1afc   : > { %711 = vmin.xlane.f32.xlu0 %v710_v33 }
0x1b89   : > { %v712_v36 = vpop.xlane.xlu0 %711 }
0x1b8a   : > { %vm713_vm3 = vcmp.eq.f32.partialorder %v710_v33, %v712_v36  ;;  %v718_v40 = vcvt.f32.s32 %v712_v36 }
0x1b8b   : > { %v714_v39 = vsel %vm713_vm3, %v709_v37, inf }
0x1b8c   : > { %715 = vmin.xlane.f32.xlu1 %v714_v39  ;;  %v719_v42 = vshll.u32 %v718_v40, 16 }
0x1c19   : > { %v716_v41 = vpop.xlane.xlu1 %715 }
0x1c1a   : > { %v717_v43 = vcvt.f32.s32 %v716_v41 }
0x1c1c   : > { %v720_v46 = vadd.s32 %v719_v42, %v717_v43 }
0x1c1e   : > { %vm721_vm4 = vcmp.eq.s32.totalorder %v1609_v9, %v720_v46  ;;  %vm722_vm5 = vcmp.eq.s32.totalorder %v1612_v12, %v720_v46 }
0x1c1f   : > { %v723_v47 = vsel %vm721_vm4, -inf, %v691_v17  ;;  %v724_v48 = vsel %vm722_vm5, -inf, %v692_v18 }
0x1c20   : > { %v725_v49 = vsel %vm191_vm0, %v723_v47, -inf  ;;  %v726_v50 = vsel %vm191_vm0, %v724_v48, -inf }
0x1c21   : > { %v727_v51 = vmax.f32 %v725_v49, %v726_v50 }
0x1c23   : > { %728 = vmax.xlane.f32.xlu0 %v727_v51 }
0x1cb0   : > { %v1808_v52 = vpop.xlane.xlu0 %728 }
0x1cb1   : > { %vm731_vm6 = vcmp.eq.f32.partialorder %v723_v47, %v1808_v52  ;;  %vm732_vm7 = vcmp.eq.f32.partialorder %v724_v48, %v1808_v52 }
0x1cb2   : > { %v733_v53 = vsel %vm731_vm6, %v1609_v9, 256  ;;  %v734_v54 = vsel %vm732_vm7, %v1612_v12, 256 }
0x1cb3   : > { %v735_v57 = vsel %vm191_vm0, %v733_v53, 2147483647  ;;  %v736_v58 = vsel %vm191_vm0, %v734_v54, 2147483647 }
0x1cb4   : > { %vm737_vm8 = vcmp.lt.s32.totalorder %v735_v57, %v736_v58 }
0x1cb5   : > { %v738_v59 = vsel %vm737_vm8, %v735_v57, %v736_v58 }
0x1cb6   : > { %v740_v61 = vshra.s32 %v738_v59, 16  ;;  %v739_v0 = vand.u32 65535, %v738_v59 }
0x1cb8   : > { %v742_v63 = vcvt.s32.f32 %v740_v61  ;;  %v741_v2 = vcvt.s32.f32 %v739_v0 }
0x1cba   : > { %743 = vmin.xlane.f32.xlu1 %v742_v63 }
0x1d47   : > { %v744_v1 = vpop.xlane.xlu1 %743 }
0x1d48   : > { %vm745_vm9 = vcmp.eq.f32.partialorder %v742_v63, %v744_v1  ;;  %v750_v5 = vcvt.f32.s32 %v744_v1 }
0x1d49   : > { %v746_v3 = vsel %vm745_vm9, %v741_v2, inf }
0x1d4a   : > { %747 = vmin.xlane.f32.xlu0 %v746_v3  ;;  %v751_v8 = vshll.u32 %v750_v5, 16 }
0x1dd7   : > { %v748_v7 = vpop.xlane.xlu0 %747 }
0x1dd8   : > { %v749_v10 = vcvt.f32.s32 %v748_v7 }
0x1dda   : > { %v752_v11 = vadd.s32 %v751_v8, %v749_v10 }
0x1ddc   : > { %vm753_vm10 = vcmp.eq.s32.totalorder %v1609_v9, %v752_v11  ;;  %vm754_vm11 = vcmp.eq.s32.totalorder %v1612_v12, %v752_v11 }
0x1ddd   : > { %v755_v14 = vsel %vm753_vm10, -inf, %v723_v47  ;;  %v756_v16 = vsel %vm754_vm11, -inf, %v724_v48 }
0x1dde   : > { %v757_v17 = vsel %vm191_vm0, %v755_v14, -inf  ;;  %v758_v18 = vsel %vm191_vm0, %v756_v16, -inf }
0x1ddf   : > { %v759_v20 = vmax.f32 %v757_v17, %v758_v18 }
0x1de1   : > { %760 = vmax.xlane.f32.xlu1 %v759_v20 }
0x1e6e   : > { %v1820_v21 = vpop.xlane.xlu1 %760 }
0x1e6f   : > { %vm763_vm12 = vcmp.eq.f32.partialorder %v755_v14, %v1820_v21  ;;  %vm764_vm13 = vcmp.eq.f32.partialorder %v756_v16, %v1820_v21 }
0x1e70   : > { %v765_v23 = vsel %vm763_vm12, %v1609_v9, 256  ;;  %v766_v25 = vsel %vm764_vm13, %v1612_v12, 256 }
0x1e71   : > { %v767_v26 = vsel %vm191_vm0, %v765_v23, 2147483647  ;;  %v768_v27 = vsel %vm191_vm0, %v766_v25, 2147483647 }
0x1e72   : > { %vm769_vm14 = vcmp.lt.s32.totalorder %v767_v26, %v768_v27 }
0x1e73   : > { %v770_v29 = vsel %vm769_vm14, %v767_v26, %v768_v27 }
0x1e74   : > { %v772_v30 = vshra.s32 %v770_v29, 16  ;;  %v771_v33 = vand.u32 65535, %v770_v29 }
0x1e76   : > { %v774_v32 = vcvt.s32.f32 %v772_v30  ;;  %v773_v36 = vcvt.s32.f32 %v771_v33 }
0x1e78   : > { %775 = vmin.xlane.f32.xlu0 %v774_v32 }
0x1f05   : > { %v776_v34 = vpop.xlane.xlu0 %775 }
0x1f06   : > { %vm777_vm15 = vcmp.eq.f32.partialorder %v774_v32, %v776_v34  ;;  %v782_v39 = vcvt.f32.s32 %v776_v34 }
0x1f07   : > { %v778_v37 = vsel %vm777_vm15, %v773_v36, inf }
0x1f08   : > { %779 = vmin.xlane.f32.xlu1 %v778_v37  ;;  %v783_v41 = vshll.u32 %v782_v39, 16 }
0x1f95   : > { %v780_v40 = vpop.xlane.xlu1 %779 }
0x1f96   : > { %v781_v42 = vcvt.f32.s32 %v780_v40 }
0x1f98   : > { %v784_v43 = vadd.s32 %v783_v41, %v781_v42 }
0x1f9a   : > { %vm785_vm1 = vcmp.eq.s32.totalorder %v1609_v9, %v784_v43  ;;  %vm786_vm2 = vcmp.eq.s32.totalorder %v1612_v12, %v784_v43 }
0x1f9b   : > { %v787_v46 = vsel %vm785_vm1, -inf, %v755_v14  ;;  %v788_v47 = vsel %vm786_vm2, -inf, %v756_v16 }
0x1f9c   : > { %v789_v48 = vsel %vm191_vm0, %v787_v46, -inf  ;;  %v790_v49 = vsel %vm191_vm0, %v788_v47, -inf }
0x1f9d   : > { %v791_v50 = vmax.f32 %v789_v48, %v790_v49 }
0x1f9f   : > { %792 = vmax.xlane.f32.xlu0 %v791_v50 }
0x202c   : > { %v1832_v51 = vpop.xlane.xlu0 %792 }
0x202d   : > { %vm795_vm3 = vcmp.eq.f32.partialorder %v787_v46, %v1832_v51  ;;  %vm796_vm4 = vcmp.eq.f32.partialorder %v788_v47, %v1832_v51 }
0x202e   : > { %v797_v53 = vsel %vm795_vm3, %v1609_v9, 256  ;;  %v798_v54 = vsel %vm796_vm4, %v1612_v12, 256 }
0x202f   : > { %v799_v57 = vsel %vm191_vm0, %v797_v53, 2147483647  ;;  %v800_v58 = vsel %vm191_vm0, %v798_v54, 2147483647 }
0x2030   : > { %vm801_vm5 = vcmp.lt.s32.totalorder %v799_v57, %v800_v58 }
0x2031   : > { %v802_v59 = vsel %vm801_vm5, %v799_v57, %v800_v58 }
0x2032   : > { %v804_v61 = vshra.s32 %v802_v59, 16  ;;  %v803_v0 = vand.u32 65535, %v802_v59 }
0x2034   : > { %v806_v63 = vcvt.s32.f32 %v804_v61  ;;  %v805_v2 = vcvt.s32.f32 %v803_v0 }
0x2036   : > { %807 = vmin.xlane.f32.xlu1 %v806_v63 }
0x20c3   : > { %v808_v1 = vpop.xlane.xlu1 %807 }
0x20c4   : > { %vm809_vm6 = vcmp.eq.f32.partialorder %v806_v63, %v808_v1  ;;  %v814_v5 = vcvt.f32.s32 %v808_v1 }
0x20c5   : > { %v810_v3 = vsel %vm809_vm6, %v805_v2, inf }
0x20c6   : > { %811 = vmin.xlane.f32.xlu0 %v810_v3  ;;  %v815_v8 = vshll.u32 %v814_v5, 16 }
0x2153   : > { %v812_v7 = vpop.xlane.xlu0 %811 }
0x2154   : > { %v813_v10 = vcvt.f32.s32 %v812_v7 }
0x2156   : > { %v816_v11 = vadd.s32 %v815_v8, %v813_v10 }
0x2158   : > { %vm817_vm7 = vcmp.eq.s32.totalorder %v1609_v9, %v816_v11  ;;  %vm818_vm8 = vcmp.eq.s32.totalorder %v1612_v12, %v816_v11 }
0x2159   : > { %v819_v14 = vsel %vm817_vm7, -inf, %v787_v46  ;;  %v820_v16 = vsel %vm818_vm8, -inf, %v788_v47 }
0x215a   : > { %v821_v17 = vsel %vm191_vm0, %v819_v14, -inf  ;;  %v822_v18 = vsel %vm191_vm0, %v820_v16, -inf }
0x215b   : > { %v823_v20 = vmax.f32 %v821_v17, %v822_v18 }
0x215d   : > { %824 = vmax.xlane.f32.xlu1 %v823_v20 }
0x21ea   : > { %v1844_v23 = vpop.xlane.xlu1 %824 }
0x21eb   : > { %vm827_vm9 = vcmp.eq.f32.partialorder %v819_v14, %v1844_v23  ;;  %vm828_vm10 = vcmp.eq.f32.partialorder %v820_v16, %v1844_v23 }
0x21ec   : > { %v829_v25 = vsel %vm827_vm9, %v1609_v9, 256  ;;  %v830_v26 = vsel %vm828_vm10, %v1612_v12, 256 }
0x21ed   : > { %v831_v27 = vsel %vm191_vm0, %v829_v25, 2147483647  ;;  %v832_v29 = vsel %vm191_vm0, %v830_v26, 2147483647 }
0x21ee   : > { %vm833_vm11 = vcmp.lt.s32.totalorder %v831_v27, %v832_v29 }
0x21ef   : > { %v834_v30 = vsel %vm833_vm11, %v831_v27, %v832_v29 }
0x21f0   : > { %v836_v32 = vshra.s32 %v834_v30, 16  ;;  %v835_v34 = vand.u32 65535, %v834_v30 }
0x21f2   : > { %v838_v33 = vcvt.s32.f32 %v836_v32  ;;  %v837_v37 = vcvt.s32.f32 %v835_v34 }
0x21f4   : > { %839 = vmin.xlane.f32.xlu0 %v838_v33 }
0x2281   : > { %v840_v36 = vpop.xlane.xlu0 %839 }
0x2282   : > { %vm841_vm12 = vcmp.eq.f32.partialorder %v838_v33, %v840_v36  ;;  %v846_v40 = vcvt.f32.s32 %v840_v36 }
0x2283   : > { %v842_v39 = vsel %vm841_vm12, %v837_v37, inf }
0x2284   : > { %843 = vmin.xlane.f32.xlu1 %v842_v39  ;;  %v847_v42 = vshll.u32 %v846_v40, 16 }
0x2311   : > { %v844_v41 = vpop.xlane.xlu1 %843 }
0x2312   : > { %v845_v43 = vcvt.f32.s32 %v844_v41 }
0x2314   : > { %v848_v46 = vadd.s32 %v847_v42, %v845_v43 }
0x2316   : > { %vm849_vm13 = vcmp.eq.s32.totalorder %v1609_v9, %v848_v46  ;;  %vm850_vm14 = vcmp.eq.s32.totalorder %v1612_v12, %v848_v46 }
0x2317   : > { %v851_v47 = vsel %vm849_vm13, -inf, %v819_v14  ;;  %v852_v48 = vsel %vm850_vm14, -inf, %v820_v16 }
0x2318   : > { %v853_v49 = vsel %vm191_vm0, %v851_v47, -inf  ;;  %v854_v50 = vsel %vm191_vm0, %v852_v48, -inf }
0x2319   : > { %v855_v53 = vmax.f32 %v853_v49, %v854_v50 }
0x231b   : > { %856 = vmax.xlane.f32.xlu0 %v855_v53 }
0x23a8   : > { %v1856_v54 = vpop.xlane.xlu0 %856 }
0x23a9   : > { %vm859_vm15 = vcmp.eq.f32.partialorder %v851_v47, %v1856_v54  ;;  %vm860_vm1 = vcmp.eq.f32.partialorder %v852_v48, %v1856_v54 }
0x23aa   : > { %v861_v57 = vsel %vm859_vm15, %v1609_v9, 256  ;;  %v862_v58 = vsel %vm860_vm1, %v1612_v12, 256 }
0x23ab   : > { %v863_v59 = vsel %vm191_vm0, %v861_v57, 2147483647  ;;  %v864_v61 = vsel %vm191_vm0, %v862_v58, 2147483647 }
0x23ac   : > { %vm865_vm2 = vcmp.lt.s32.totalorder %v863_v59, %v864_v61 }
0x23ad   : > { %v866_v63 = vsel %vm865_vm2, %v863_v59, %v864_v61 }
0x23ae   : > { %v868_v0 = vshra.s32 %v866_v63, 16  ;;  %v867_v2 = vand.u32 65535, %v866_v63 }
0x23b0   : > { %v870_v1 = vcvt.s32.f32 %v868_v0  ;;  %v869_v5 = vcvt.s32.f32 %v867_v2 }
0x23b2   : > { %871 = vmin.xlane.f32.xlu1 %v870_v1 }
0x243f   : > { %v872_v3 = vpop.xlane.xlu1 %871 }
0x2440   : > { %vm873_vm3 = vcmp.eq.f32.partialorder %v870_v1, %v872_v3  ;;  %v878_v8 = vcvt.f32.s32 %v872_v3 }
0x2441   : > { %v874_v7 = vsel %vm873_vm3, %v869_v5, inf }
0x2442   : > { %875 = vmin.xlane.f32.xlu0 %v874_v7  ;;  %v879_v11 = vshll.u32 %v878_v8, 16 }
0x24cf   : > { %v876_v10 = vpop.xlane.xlu0 %875 }
0x24d0   : > { %v877_v14 = vcvt.f32.s32 %v876_v10 }
0x24d2   : > { %v880_v16 = vadd.s32 %v879_v11, %v877_v14 }
0x24d4   : > { %vm881_vm4 = vcmp.eq.s32.totalorder %v1609_v9, %v880_v16  ;;  %vm882_vm5 = vcmp.eq.s32.totalorder %v1612_v12, %v880_v16 }
0x24d5   : > { %v883_v17 = vsel %vm881_vm4, -inf, %v851_v47  ;;  %v884_v18 = vsel %vm882_vm5, -inf, %v852_v48 }
0x24d6   : > { %v885_v20 = vsel %vm191_vm0, %v883_v17, -inf  ;;  %v886_v25 = vsel %vm191_vm0, %v884_v18, -inf }
0x24d7   : > { %v887_v26 = vmax.f32 %v885_v20, %v886_v25 }
0x24d9   : > { %888 = vmax.xlane.f32.xlu1 %v887_v26 }
0x2566   : > { %v1868_v27 = vpop.xlane.xlu1 %888 }
0x2567   : > { %vm891_vm6 = vcmp.eq.f32.partialorder %v883_v17, %v1868_v27  ;;  %vm892_vm7 = vcmp.eq.f32.partialorder %v884_v18, %v1868_v27 }
0x2568   : > { %v893_v29 = vsel %vm891_vm6, %v1609_v9, 256  ;;  %v894_v30 = vsel %vm892_vm7, %v1612_v12, 256 }
0x2569   : > { %v895_v32 = vsel %vm191_vm0, %v893_v29, 2147483647  ;;  %v896_v33 = vsel %vm191_vm0, %v894_v30, 2147483647 }
0x256a   : > { %vm897_vm8 = vcmp.lt.s32.totalorder %v895_v32, %v896_v33 }
0x256b   : > { %v898_v34 = vsel %vm897_vm8, %v895_v32, %v896_v33 }
0x256c   : > { %v900_v36 = vshra.s32 %v898_v34, 16  ;;  %v899_v39 = vand.u32 65535, %v898_v34 }
0x256e   : > { %v902_v37 = vcvt.s32.f32 %v900_v36  ;;  %v901_v41 = vcvt.s32.f32 %v899_v39 }
0x2570   : > { %903 = vmin.xlane.f32.xlu0 %v902_v37 }
0x25fd   : > { %v904_v40 = vpop.xlane.xlu0 %903 }
0x25fe   : > { %vm905_vm9 = vcmp.eq.f32.partialorder %v902_v37, %v904_v40  ;;  %v910_v43 = vcvt.f32.s32 %v904_v40 }
0x25ff   : > { %v906_v42 = vsel %vm905_vm9, %v901_v41, inf }
0x2600   : > { %907 = vmin.xlane.f32.xlu1 %v906_v42  ;;  %v911_v47 = vshll.u32 %v910_v43, 16 }
0x268d   : > { %v908_v46 = vpop.xlane.xlu1 %907 }
0x268e   : > { %v909_v48 = vcvt.f32.s32 %v908_v46 }
0x2690   : > { %v912_v49 = vadd.s32 %v911_v47, %v909_v48 }
0x2692   : > { %vm913_vm10 = vcmp.eq.s32.totalorder %v1609_v9, %v912_v49  ;;  %vm914_vm11 = vcmp.eq.s32.totalorder %v1612_v12, %v912_v49 }
0x2693   : > { %v915_v50 = vsel %vm913_vm10, -inf, %v883_v17  ;;  %v916_v53 = vsel %vm914_vm11, -inf, %v884_v18 }
0x2694   : > { %v917_v57 = vsel %vm191_vm0, %v915_v50, -inf  ;;  %v918_v58 = vsel %vm191_vm0, %v916_v53, -inf }
0x2695   : > { %v919_v59 = vmax.f32 %v917_v57, %v918_v58 }
0x2697   : > { %920 = vmax.xlane.f32.xlu0 %v919_v59 }
0x2724   : > { %v1880_v61 = vpop.xlane.xlu0 %920 }
0x2725   : > { %vm923_vm12 = vcmp.eq.f32.partialorder %v915_v50, %v1880_v61  ;;  %vm924_vm13 = vcmp.eq.f32.partialorder %v916_v53, %v1880_v61 }
0x2726   : > { %v925_v63 = vsel %vm923_vm12, %v1609_v9, 256  ;;  %v926_v0 = vsel %vm924_vm13, %v1612_v12, 256 }
0x2727   : > { %v927_v1 = vsel %vm191_vm0, %v925_v63, 2147483647  ;;  %v928_v2 = vsel %vm191_vm0, %v926_v0, 2147483647 }
0x2728   : > { %vm929_vm14 = vcmp.lt.s32.totalorder %v927_v1, %v928_v2 }
0x2729   : > { %v930_v3 = vsel %vm929_vm14, %v927_v1, %v928_v2 }
0x272a   : > { %v932_v5 = vshra.s32 %v930_v3, 16  ;;  %v931_v8 = vand.u32 65535, %v930_v3 }
0x272c   : > { %v934_v7 = vcvt.s32.f32 %v932_v5  ;;  %v933_v11 = vcvt.s32.f32 %v931_v8 }
0x272e   : > { %935 = vmin.xlane.f32.xlu1 %v934_v7 }
0x27bb   : > { %v936_v10 = vpop.xlane.xlu1 %935 }
0x27bc   : > { %vm937_vm15 = vcmp.eq.f32.partialorder %v934_v7, %v936_v10  ;;  %v942_v16 = vcvt.f32.s32 %v936_v10 }
0x27bd   : > { %v938_v14 = vsel %vm937_vm15, %v933_v11, inf }
0x27be   : > { %939 = vmin.xlane.f32.xlu0 %v938_v14  ;;  %v943_v18 = vshll.u32 %v942_v16, 16 }
0x284b   : > { %v940_v17 = vpop.xlane.xlu0 %939 }
0x284c   : > { %v941_v20 = vcvt.f32.s32 %v940_v17 }
0x284e   : > { %v944_v25 = vadd.s32 %v943_v18, %v941_v20 }
0x2850   : > { %vm945_vm1 = vcmp.eq.s32.totalorder %v1609_v9, %v944_v25  ;;  %vm946_vm2 = vcmp.eq.s32.totalorder %v1612_v12, %v944_v25 }
0x2851   : > { %v947_v26 = vsel %vm945_vm1, -inf, %v915_v50  ;;  %v948_v29 = vsel %vm946_vm2, -inf, %v916_v53 }
0x2852   : > { %v949_v30 = vsel %vm191_vm0, %v947_v26, -inf  ;;  %v950_v32 = vsel %vm191_vm0, %v948_v29, -inf }
0x2853   : > { %v951_v33 = vmax.f32 %v949_v30, %v950_v32 }
0x2855   : > { %952 = vmax.xlane.f32.xlu1 %v951_v33 }
0x28e2   : > { %v1892_v34 = vpop.xlane.xlu1 %952 }
0x28e3   : > { %vm955_vm3 = vcmp.eq.f32.partialorder %v947_v26, %v1892_v34  ;;  %vm956_vm4 = vcmp.eq.f32.partialorder %v948_v29, %v1892_v34 }
0x28e4   : > { %v957_v36 = vsel %vm955_vm3, %v1609_v9, 256  ;;  %v958_v37 = vsel %vm956_vm4, %v1612_v12, 256 }
0x28e5   : > { %v959_v39 = vsel %vm191_vm0, %v957_v36, 2147483647  ;;  %v960_v40 = vsel %vm191_vm0, %v958_v37, 2147483647 }
0x28e6   : > { %vm961_vm5 = vcmp.lt.s32.totalorder %v959_v39, %v960_v40 }
0x28e7   : > { %v962_v41 = vsel %vm961_vm5, %v959_v39, %v960_v40 }
0x28e8   : > { %v964_v42 = vshra.s32 %v962_v41, 16  ;;  %v963_v46 = vand.u32 65535, %v962_v41 }
0x28ea   : > { %v966_v43 = vcvt.s32.f32 %v964_v42  ;;  %v965_v48 = vcvt.s32.f32 %v963_v46 }
0x28ec   : > { %967 = vmin.xlane.f32.xlu0 %v966_v43 }
0x2979   : > { %v968_v47 = vpop.xlane.xlu0 %967 }
0x297a   : > { %vm969_vm6 = vcmp.eq.f32.partialorder %v966_v43, %v968_v47  ;;  %v974_v50 = vcvt.f32.s32 %v968_v47 }
0x297b   : > { %v970_v49 = vsel %vm969_vm6, %v965_v48, inf }
0x297c   : > { %971 = vmin.xlane.f32.xlu1 %v970_v49  ;;  %v975_v57 = vshll.u32 %v974_v50, 16 }
0x2a09   : > { %v972_v53 = vpop.xlane.xlu1 %971 }
0x2a0a   : > { %v973_v58 = vcvt.f32.s32 %v972_v53 }
0x2a0c   : > { %v976_v59 = vadd.s32 %v975_v57, %v973_v58 }
0x2a0e   : > { %vm977_vm7 = vcmp.eq.s32.totalorder %v1609_v9, %v976_v59  ;;  %vm978_vm8 = vcmp.eq.s32.totalorder %v1612_v12, %v976_v59 }
0x2a0f   : > { %v979_v63 = vsel %vm977_vm7, -inf, %v947_v26  ;;  %v980_v0 = vsel %vm978_vm8, -inf, %v948_v29 }
0x2a10   : > { %v981_v1 = vsel %vm191_vm0, %v979_v63, -inf  ;;  %v982_v2 = vsel %vm191_vm0, %v980_v0, -inf }
0x2a11   : > { %v983_v3 = vmax.f32 %v981_v1, %v982_v2 }
0x2a13   : > { %984 = vmax.xlane.f32.xlu0 %v983_v3 }
0x2aa0   : > { %v1904_v5 = vpop.xlane.xlu0 %984 }
0x2aa1   : > { %vm987_vm9 = vcmp.eq.f32.partialorder %v979_v63, %v1904_v5  ;;  %vm988_vm10 = vcmp.eq.f32.partialorder %v980_v0, %v1904_v5 }
0x2aa2   : > { %v989_v7 = vsel %vm987_vm9, %v1609_v9, 256  ;;  %v990_v8 = vsel %vm988_vm10, %v1612_v12, 256 }
0x2aa3   : > { %v991_v10 = vsel %vm191_vm0, %v989_v7, 2147483647  ;;  %v992_v11 = vsel %vm191_vm0, %v990_v8, 2147483647 }
0x2aa4   : > { %vm993_vm11 = vcmp.lt.s32.totalorder %v991_v10, %v992_v11 }
0x2aa5   : > { %v994_v14 = vsel %vm993_vm11, %v991_v10, %v992_v11 }
0x2aa6   : > { %v996_v16 = vshra.s32 %v994_v14, 16  ;;  %v995_v18 = vand.u32 65535, %v994_v14 }
0x2aa8   : > { %v998_v17 = vcvt.s32.f32 %v996_v16  ;;  %v997_v25 = vcvt.s32.f32 %v995_v18 }
0x2aaa   : > { %999 = vmin.xlane.f32.xlu1 %v998_v17 }
0x2b37   : > { %v1000_v20 = vpop.xlane.xlu1 %999 }
0x2b38   : > { %vm1001_vm12 = vcmp.eq.f32.partialorder %v998_v17, %v1000_v20  ;;  %v1006_v29 = vcvt.f32.s32 %v1000_v20 }
0x2b39   : > { %v1002_v26 = vsel %vm1001_vm12, %v997_v25, inf }
0x2b3a   : > { %1003 = vmin.xlane.f32.xlu0 %v1002_v26  ;;  %v1007_v32 = vshll.u32 %v1006_v29, 16 }
0x2bc7   : > { %v1004_v30 = vpop.xlane.xlu0 %1003 }
0x2bc8   : > { %v1005_v33 = vcvt.f32.s32 %v1004_v30 }
0x2bca   : > { %v1008_v36 = vadd.s32 %v1007_v32, %v1005_v33 }
0x2bcc   : > { %vm1009_vm13 = vcmp.eq.s32.totalorder %v1609_v9, %v1008_v36  ;;  %vm1010_vm14 = vcmp.eq.s32.totalorder %v1612_v12, %v1008_v36 }
0x2bcd   : > { %v1011_v37 = vsel %vm1009_vm13, -inf, %v979_v63  ;;  %v1012_v39 = vsel %vm1010_vm14, -inf, %v980_v0 }
0x2bce   : > { %v1013_v40 = vsel %vm191_vm0, %v1011_v37, -inf  ;;  %v1014_v41 = vsel %vm191_vm0, %v1012_v39, -inf }
0x2bcf   : > { %v1015_v42 = vmax.f32 %v1013_v40, %v1014_v41 }
0x2bd1   : > { %1016 = vmax.xlane.f32.xlu1 %v1015_v42 }
0x2c5e   : > { %v1916_v43 = vpop.xlane.xlu1 %1016 }
0x2c5f   : > { %vm1019_vm15 = vcmp.eq.f32.partialorder %v1011_v37, %v1916_v43  ;;  %vm1020_vm1 = vcmp.eq.f32.partialorder %v1012_v39, %v1916_v43 }
0x2c60   : > { %v1021_v46 = vsel %vm1019_vm15, %v1609_v9, 256  ;;  %v1022_v47 = vsel %vm1020_vm1, %v1612_v12, 256 }
0x2c61   : > { %v1023_v48 = vsel %vm191_vm0, %v1021_v46, 2147483647  ;;  %v1024_v49 = vsel %vm191_vm0, %v1022_v47, 2147483647 }
0x2c62   : > { %vm1025_vm2 = vcmp.lt.s32.totalorder %v1023_v48, %v1024_v49 }
0x2c63   : > { %v1026_v50 = vsel %vm1025_vm2, %v1023_v48, %v1024_v49 }
0x2c64   : > { %v1028_v53 = vshra.s32 %v1026_v50, 16  ;;  %v1027_v58 = vand.u32 65535, %v1026_v50 }
0x2c66   : > { %v1030_v57 = vcvt.s32.f32 %v1028_v53  ;;  %v1029_v63 = vcvt.s32.f32 %v1027_v58 }
0x2c68   : > { %1031 = vmin.xlane.f32.xlu0 %v1030_v57 }
0x2cf5   : > { %v1032_v59 = vpop.xlane.xlu0 %1031 }
0x2cf6   : > { %vm1033_vm3 = vcmp.eq.f32.partialorder %v1030_v57, %v1032_v59  ;;  %v1038_v1 = vcvt.f32.s32 %v1032_v59 }
0x2cf7   : > { %v1034_v0 = vsel %vm1033_vm3, %v1029_v63, inf }
0x2cf8   : > { %1035 = vmin.xlane.f32.xlu1 %v1034_v0  ;;  %v1039_v3 = vshll.u32 %v1038_v1, 16 }
0x2d85   : > { %v1036_v2 = vpop.xlane.xlu1 %1035 }
0x2d86   : > { %v1037_v7 = vcvt.f32.s32 %v1036_v2 }
0x2d88   : > { %v1040_v8 = vadd.s32 %v1039_v3, %v1037_v7 }
0x2d8a   : > { %vm1041_vm4 = vcmp.eq.s32.totalorder %v1609_v9, %v1040_v8  ;;  %vm1042_vm5 = vcmp.eq.s32.totalorder %v1612_v12, %v1040_v8 }
0x2d8b   : > { %v1043_v10 = vsel %vm1041_vm4, -inf, %v1011_v37  ;;  %v1044_v11 = vsel %vm1042_vm5, -inf, %v1012_v39 }
0x2d8c   : > { %v1045_v14 = vsel %vm191_vm0, %v1043_v10, -inf  ;;  %v1046_v16 = vsel %vm191_vm0, %v1044_v11, -inf }
0x2d8d   : > { %v1047_v17 = vmax.f32 %v1045_v14, %v1046_v16 }
0x2d8f   : > { %1048 = vmax.xlane.f32.xlu0 %v1047_v17 }
0x2e1c   : > { %v1928_v18 = vpop.xlane.xlu0 %1048 }
0x2e1d   : > { %vm1051_vm6 = vcmp.eq.f32.partialorder %v1043_v10, %v1928_v18  ;;  %vm1052_vm7 = vcmp.eq.f32.partialorder %v1044_v11, %v1928_v18 }
0x2e1e   : > { %v1053_v20 = vsel %vm1051_vm6, %v1609_v9, 256  ;;  %v1054_v25 = vsel %vm1052_vm7, %v1612_v12, 256 }
0x2e1f   : > { %v1055_v26 = vsel %vm191_vm0, %v1053_v20, 2147483647  ;;  %v1056_v29 = vsel %vm191_vm0, %v1054_v25, 2147483647 }
0x2e20   : > { %vm1057_vm8 = vcmp.lt.s32.totalorder %v1055_v26, %v1056_v29 }
0x2e21   : > { %v1058_v30 = vsel %vm1057_vm8, %v1055_v26, %v1056_v29 }
0x2e22   : > { %v1060_v32 = vshra.s32 %v1058_v30, 16  ;;  %v1059_v36 = vand.u32 65535, %v1058_v30 }
0x2e24   : > { %v1062_v33 = vcvt.s32.f32 %v1060_v32  ;;  %v1061_v39 = vcvt.s32.f32 %v1059_v36 }
0x2e26   : > { %1063 = vmin.xlane.f32.xlu1 %v1062_v33 }
0x2eb3   : > { %v1064_v37 = vpop.xlane.xlu1 %1063 }
0x2eb4   : > { %vm1065_vm9 = vcmp.eq.f32.partialorder %v1062_v33, %v1064_v37  ;;  %v1070_v41 = vcvt.f32.s32 %v1064_v37 }
0x2eb5   : > { %v1066_v40 = vsel %vm1065_vm9, %v1061_v39, inf }
0x2eb6   : > { %1067 = vmin.xlane.f32.xlu0 %v1066_v40  ;;  %v1071_v46 = vshll.u32 %v1070_v41, 16 }
0x2f43   : > { %v1068_v42 = vpop.xlane.xlu0 %1067 }
0x2f44   : > { %v1069_v47 = vcvt.f32.s32 %v1068_v42 }
0x2f46   : > { %v1072_v48 = vadd.s32 %v1071_v46, %v1069_v47 }
0x2f48   : > { %vm1073_vm10 = vcmp.eq.s32.totalorder %v1609_v9, %v1072_v48  ;;  %vm1074_vm11 = vcmp.eq.s32.totalorder %v1612_v12, %v1072_v48 }
0x2f49   : > { %v1075_v49 = vsel %vm1073_vm10, -inf, %v1043_v10  ;;  %v1076_v50 = vsel %vm1074_vm11, -inf, %v1044_v11 }
0x2f4a   : > { %v1077_v53 = vsel %vm191_vm0, %v1075_v49, -inf  ;;  %v1078_v57 = vsel %vm191_vm0, %v1076_v50, -inf }
0x2f4b   : > { %v1079_v58 = vmax.f32 %v1077_v53, %v1078_v57 }
0x2f4d   : > { %1080 = vmax.xlane.f32.xlu1 %v1079_v58 }
0x2fda   : > { %v1940_v59 = vpop.xlane.xlu1 %1080 }
0x2fdb   : > { %vm1083_vm12 = vcmp.eq.f32.partialorder %v1075_v49, %v1940_v59  ;;  %vm1084_vm13 = vcmp.eq.f32.partialorder %v1076_v50, %v1940_v59 }
0x2fdc   : > { %v1085_v63 = vsel %vm1083_vm12, %v1609_v9, 256  ;;  %v1086_v0 = vsel %vm1084_vm13, %v1612_v12, 256 }
0x2fdd   : > { %v1087_v1 = vsel %vm191_vm0, %v1085_v63, 2147483647  ;;  %v1088_v2 = vsel %vm191_vm0, %v1086_v0, 2147483647 }
0x2fde   : > { %vm1089_vm14 = vcmp.lt.s32.totalorder %v1087_v1, %v1088_v2 }
0x2fdf   : > { %v1090_v3 = vsel %vm1089_vm14, %v1087_v1, %v1088_v2 }
0x2fe0   : > { %v1092_v7 = vshra.s32 %v1090_v3, 16  ;;  %v1091_v10 = vand.u32 65535, %v1090_v3 }
0x2fe2   : > { %v1094_v8 = vcvt.s32.f32 %v1092_v7  ;;  %v1093_v14 = vcvt.s32.f32 %v1091_v10 }
0x2fe4   : > { %1095 = vmin.xlane.f32.xlu0 %v1094_v8 }
0x3071   : > { %v1096_v11 = vpop.xlane.xlu0 %1095 }
0x3072   : > { %vm1097_vm15 = vcmp.eq.f32.partialorder %v1094_v8, %v1096_v11  ;;  %v1102_v17 = vcvt.f32.s32 %v1096_v11 }
0x3073   : > { %v1098_v16 = vsel %vm1097_vm15, %v1093_v14, inf }
0x3074   : > { %1099 = vmin.xlane.f32.xlu1 %v1098_v16  ;;  %v1103_v25 = vshll.u32 %v1102_v17, 16 }
0x3101   : > { %v1100_v20 = vpop.xlane.xlu1 %1099 }
0x3102   : > { %v1101_v26 = vcvt.f32.s32 %v1100_v20 }
0x3104   : > { %v1104_v29 = vadd.s32 %v1103_v25, %v1101_v26 }
0x3106   : > { %vm1105_vm1 = vcmp.eq.s32.totalorder %v1609_v9, %v1104_v29  ;;  %vm1106_vm2 = vcmp.eq.s32.totalorder %v1612_v12, %v1104_v29 }
0x3107   : > { %v1107_v30 = vsel %vm1105_vm1, -inf, %v1075_v49  ;;  %v1108_v32 = vsel %vm1106_vm2, -inf, %v1076_v50 }
0x3108   : > { %v1109_v33 = vsel %vm191_vm0, %v1107_v30, -inf  ;;  %v1110_v36 = vsel %vm191_vm0, %v1108_v32, -inf }
0x3109   : > { %v1111_v37 = vmax.f32 %v1109_v33, %v1110_v36 }
0x310b   : > { %1112 = vmax.xlane.f32.xlu0 %v1111_v37 }
0x3198   : > { %v1952_v39 = vpop.xlane.xlu0 %1112 }
0x3199   : > { %vm1115_vm3 = vcmp.eq.f32.partialorder %v1107_v30, %v1952_v39  ;;  %vm1116_vm4 = vcmp.eq.f32.partialorder %v1108_v32, %v1952_v39 }
0x319a   : > { %v1117_v40 = vsel %vm1115_vm3, %v1609_v9, 256  ;;  %v1118_v41 = vsel %vm1116_vm4, %v1612_v12, 256 }
0x319b   : > { %v1119_v42 = vsel %vm191_vm0, %v1117_v40, 2147483647  ;;  %v1120_v46 = vsel %vm191_vm0, %v1118_v41, 2147483647  ;;  %v1973_v41 = vld [vmem:[%s1600_s7] sm:$0xff] }
0x319c   : > { %vm1121_vm5 = vcmp.lt.s32.totalorder %v1119_v42, %v1120_v46 }
0x319d   : > { %v1122_v47 = vsel %vm1121_vm5, %v1119_v42, %v1120_v46  ;;  %v189_v42 = vcombine.high %v1973_v41, %v1973_v41  ;;  %v192_v46 = vsel %vm191_vm0, %v1973_v41, 0.0 }
0x319e   : > { %v1124_v48 = vshra.s32 %v1122_v47, 16  ;;  %v1123_v50 = vand.u32 65535, %v1122_v47 }
0x319f   : > { %v193_v47 = vsel %vm191_vm0, %v189_v42, 0.0 }
0x31a0   : > { %v1126_v49 = vcvt.s32.f32 %v1124_v48  ;;  %v1125_v57 = vcvt.s32.f32 %v1123_v50  ;;  %v194_v48 = vadd.f32 %v193_v47, %v192_v46 }
0x31a2   : > { %1127 = vmin.xlane.f32.xlu1 %v1126_v49 }
0x322f   : > { %v1128_v53 = vpop.xlane.xlu1 %1127 }
0x3230   : > { %vm1129_vm6 = vcmp.eq.f32.partialorder %v1126_v49, %v1128_v53  ;;  %v1134_v63 = vcvt.f32.s32 %v1128_v53 }
0x3231   : > { %v1130_v58 = vsel %vm1129_vm6, %v1125_v57, inf }
0x3232   : > { %1131 = vmin.xlane.f32.xlu0 %v1130_v58  ;;  %v1135_v1 = vshll.u32 %v1134_v63, 16 }
0x32bf   : > { %v1132_v0 = vpop.xlane.xlu0 %1131 }
0x32c0   : > { %v1133_v2 = vcvt.f32.s32 %v1132_v0 }
0x32c2   : > { %v1136_v3 = vadd.s32 %v1135_v1, %v1133_v2 }
0x32c4   : > { %vm1137_vm7 = vcmp.eq.s32.totalorder %v1609_v9, %v1136_v3  ;;  %vm1138_vm8 = vcmp.eq.s32.totalorder %v1612_v12, %v1136_v3 }
0x32c5   : > { %v1139_v7 = vsel %vm1137_vm7, -inf, %v1107_v30  ;;  %v1140_v8 = vsel %vm1138_vm8, -inf, %v1108_v32 }
0x32c6   : > { %v1141_v10 = vsel %vm191_vm0, %v1139_v7, -inf  ;;  %v1142_v11 = vsel %vm191_vm0, %v1140_v8, -inf }
0x32c7   : > { %v1143_v14 = vmax.f32 %v1141_v10, %v1142_v11  ;;  %v250_v10 = vadd.f32 %v1628_v38, %v1618_v15 }
0x32c9   : > { %1144 = vmax.xlane.f32.xlu1 %v1143_v14  ;;  %v282_v11 = vadd.f32 %v1640_v60, %v250_v10 }
0x32cb   : > { %v314_v14 = vadd.f32 %v1652_v22, %v282_v11 }
0x3356   : > { %v1964_v16 = vpop.xlane.xlu1 %1144 }
0x3357   : > { %vm1147_vm9 = vcmp.eq.f32.partialorder %v1139_v7, %v1964_v16  ;;  %vm1148_vm10 = vcmp.eq.f32.partialorder %v1140_v8, %v1964_v16 }
0x3358   : > { %v1149_v17 = vsel %vm1147_vm9, %v1609_v9, 256  ;;  %v1150_v20 = vsel %vm1148_vm10, %v1612_v12, 256 }
0x3359   : > { %v1151_v25 = vsel %vm191_vm0, %v1149_v17, 2147483647  ;;  %v1152_v26 = vsel %vm191_vm0, %v1150_v20, 2147483647  ;;  %v346_v17 = vadd.f32 %v1664_v45, %v314_v14 }
0x335a   : > { %vm1153_vm11 = vcmp.lt.s32.totalorder %v1151_v25, %v1152_v26 }
0x335b   : > { %v1154_v29 = vsel %vm1153_vm11, %v1151_v25, %v1152_v26 }
0x335c   : > { %v1156_v30 = vshra.s32 %v1154_v29, 16  ;;  %v1155_v33 = vand.u32 65535, %v1154_v29 }
0x335e   : > { %v1158_v32 = vcvt.s32.f32 %v1156_v30  ;;  %v1157_v37 = vcvt.s32.f32 %v1155_v33 }
0x3360   : > { %1159 = vmin.xlane.f32.xlu0 %v1158_v32 }
0x33ed   : > { %v1160_v36 = vpop.xlane.xlu0 %1159 }
0x33ee   : > { %vm1161_vm12 = vcmp.eq.f32.partialorder %v1158_v32, %v1160_v36  ;;  %v1166_v49 = vcvt.f32.s32 %v1160_v36  ;;  %v1192_v32 = vld [vmem:[%s2074_s2] sm:$0xf] }
0x33ef   : > { %v1162_v40 = vsel %vm1161_vm12, %v1157_v37, inf }
0x33f0   : > { %1163 = vmin.xlane.f32.xlu1 %v1162_v40  ;;  %v1167_v53 = vshll.u32 %v1166_v49, 16 }
0x33f4   : > { %195 = vadd.xlane.f32.xlu1 %v194_v48 }
0x347d   : > { %v1164_v50 = vpop.xlane.xlu1 %1163 }
0x347e   : > { %v1165_v57 = vcvt.f32.s32 %v1164_v50 }
0x3480   : > { %v1168_v58 = vadd.s32 %v1167_v53, %v1165_v57 }
0x3481   : > { %v196_v26 = vpop.xlane.xlu1 %195 }
0x3482   : > { %vm1169_vm13 = vcmp.eq.s32.totalorder %v1609_v9, %v1168_v58  ;;  %vm1170_vm14 = vcmp.eq.s32.totalorder %v1612_v12, %v1168_v58  ;;  %v378_v9 = vadd.f32 %v1676_v4, %v346_v17 }
0x3483   : > { %v1171_v63 = vsel %vm1169_vm13, -inf, %v1139_v7  ;;  %v1172_v0 = vsel %vm1170_vm14, -inf, %v1140_v8 }
0x3484   : > { %v1173_v1 = vsel %vm191_vm0, %v1171_v63, -inf  ;;  %v1174_v2 = vsel %vm191_vm0, %v1172_v0, -inf  ;;  %v410_v12 = vadd.f32 %v1688_v31, %v378_v9  ;;  %vm1184_vm0 = vcmask 11264  }
0x3485   : > { %v1175_v3 = vmax.f32 %v1173_v1, %v1174_v2 }
0x3486   : > { %v442_v7 = vadd.f32 %v1700_v55, %v410_v12 }
0x3487   : > { %1176 = vmax.xlane.f32.xlu0 %v1175_v3 }
0x3488   : > { %v474_v8 = vadd.f32 %v1712_v19, %v442_v7 }
0x348a   : > { %v506_v20 = vadd.f32 %v1724_v44, %v474_v8 }
0x348c   : > { %v538_v25 = vadd.f32 %v1736_v6, %v506_v20 }
0x348e   : > { %v570_v15 = vadd.f32 %v1748_v35, %v538_v25 }
0x3490   : > { %v602_v38 = vadd.f32 %v1760_v62, %v570_v15 }
0x3492   : > { %v634_v60 = vadd.f32 %v1772_v28, %v602_v38 }
0x3494   : > { %v666_v22 = vadd.f32 %v1784_v56, %v634_v60 }
0x3496   : > { %v698_v45 = vadd.f32 %v1796_v24, %v666_v22 }
0x3498   : > { %v730_v4 = vadd.f32 %v1808_v52, %v698_v45 }
0x349a   : > { %v762_v31 = vadd.f32 %v1820_v21, %v730_v4 }
0x349c   : > { %v794_v55 = vadd.f32 %v1832_v51, %v762_v31 }
0x349e   : > { %v826_v19 = vadd.f32 %v1844_v23, %v794_v55 }
0x34a0   : > { %v858_v44 = vadd.f32 %v1856_v54, %v826_v19 }
0x34a2   : > { %v890_v6 = vadd.f32 %v1868_v27, %v858_v44 }
0x34a4   : > { %v922_v35 = vadd.f32 %v1880_v61, %v890_v6  ;;  %v1182_v61 = vld [vmem:[%s2073_s1] sm:$0xf] }
0x34a6   : > { %v954_v62 = vadd.f32 %v1892_v34, %v922_v35 }
0x34a8   : > { %v986_v28 = vadd.f32 %v1904_v5, %v954_v62 }
0x34aa   : > { %v1018_v56 = vadd.f32 %v1916_v43, %v986_v28 }
0x34ac   : > { %v1050_v24 = vadd.f32 %v1928_v18, %v1018_v56 }
0x34ae   : > { %v1082_v52 = vadd.f32 %v1940_v59, %v1050_v24 }
0x34b0   : > { %v1114_v21 = vadd.f32 %v1952_v39, %v1082_v52 }
0x34b2   : > { %v1146_v51 = vadd.f32 %v1964_v16, %v1114_v21 }
0x3514   : > { %v1177_v23 = vpop.xlane.xlu0 %1176 }
0x3515   : > { %v1178_v54 = vadd.f32 %v1177_v23, %v1146_v51 }
0x3517   : > { %v1179_v27 = vmul.f32 -1.0, %v1178_v54 }
0x3519   : > { %v1180_v29 = vsub.f32 %v196_v26, %v1179_v27 }
0x351b   : > { %v1181_v34 = vmul.f32 0.0044444446, %v1180_v29 }
0x351d   : > { %v1183_v5 = vmul.f32 %v1182_v61, %v1181_v34 }
0x351f   : > { %v1185_v43 = vsel %vm1184_vm0, %v1183_v5, 0.0 }
0x3520   : > { %v1186_v18 = vrot.slane %v1185_v43, 4 }
0x3522   : > { %v1187_v30 = vadd.f32 %v1186_v18, %v1185_v43 }
0x3524   : > { %v1188_v59 = vrot.slane %v1187_v30, 2 }
0x3526   : > { %v1189_v39 = vadd.f32 %v1188_v59, %v1187_v30 }
0x3528   : > { %v1190_v16 = vrot.slane %v1189_v39, 1 }
0x352a   : > { %v1191_v33 = vadd.f32 %v1190_v16, %v1189_v39 }
0x352c   : > { %v1193_v36 = vmul.f32 %v1192_v32, %v1191_v33 }
0x352e   : > { %v1194_v37 = vsel %vm1184_vm0, %v1193_v36, 0.0 }
0x352f   : > { %1195 = vadd.xlane.f32.xlu0 %v1194_v37 }
0x35bc   : > { %v1196_v40 = vpop.xlane.xlu0 %1195 }
0x35bd   : > { %v1197_v42 = vsub.f32 0.0, %v1196_v40 }
0x35bf   : > { %v1198_v46 = vmul.f32 1.442695, %v1197_v42 }
0x35c1   : > { %1363 = vpow2.f32 %v1198_v46 }
0x35cb   : > { %v1364_v47 = vpop.eup %1363 }
0x35cc   : > { %v1200_v48 = vadd.f32 1.0, %v1364_v47 }
0x35ce   : > { %1365 = vrcp.f32 %v1200_v48 }
0x35d8   : > { %v1366_v49 = vpop.eup %1365 }
0x35d9   : > { %v1210_v50 = vrot.slane %v1366_v49, %v1614_v13 }
0x35db   : > { %v1212_v53 = vmul.f32 %v1973_v41, %v1210_v50 }
0x35dd   : > { %1213 = vst [vmem:[%s186_s10] sm:$0xff] %v1212_v53 }
0x35de   : > { %1411 = shalt.err (!%p1408_p4)
}
0x35df   : > { %s1412_s29 = scalar_lea.hbm %s2028_s20, 128  ;;  %s1416_s7 = scalar_lea.hbm %s2075_s3, 256 }
0x35e0   : > { %p1413_p5 = scmp.ne.s32.totalorder %s2028_s20, %s1412_s29  ;;  %p1417_p0 = scmp.lt.u32.totalorder %s2028_s20, %s2075_s3 }
0x35e1   : > { %p1418_p1 = scmp.lt.u32.totalorder %s1416_s7, %s1412_s29  ;;  %p1420_p6 = scmp.lt.u32.totalorder %s1412_s29, %s2028_s20 }
0x35e2   : > { %p1414_p8 = pnand %p1413_p5, %p2084_p11 }
0x35e3   : > { %p1419_p3 = por %p1418_p1, %p1417_p0 }
0x35e4   : > { %p1415_p9 = pneg %p1414_p8 }
0x35e5   : > { %p1421_p12 = por %p1420_p6, %p1419_p3 }
0x35e7   : > { %p1422_p13 = pnand %p1421_p12, %p1415_p9 }
0x35e9   : > { %1425 = shalt.err (!%p1422_p13)
}
0x35ea   : > { %1317 = dma.vmem_to_hbm [thread:$0]  (%p2084_p11), %s2030_s11, 128, %s2028_s20, %s1215_s22  }
0x35eb PF: > { %s1241_s6 = sand.u32 1, %s1452_s12   ;;  %p2085_p7 = scmp.ne.s32.totalorder %s2080_s25, 0 }
0x35ec   : > { %p2086_p10 = scmp.ge.s32.totalorder %s1464_s15, 2  ;;  %s1242_s8 = scalar_lea.sflag [#allocation4], %s1241_s6 }
0x35ee   : > { %p1324_p2 = pnand %p2086_p10, %p2085_p7 }
0x35f0   : > { %1447 = dma.done.wait (!%p1324_p2), %s1242_s8, 128  }
0x35f1   : > { %1449 = vsyncadd (!%p1324_p2), %s1242_s8, 4294967168  ;;  %p16_p4 = scmp.ge.s32.totalorder %s1514_s18, 4   ;;  %s2087_s12 = smov %s1456_s13 }
0x35f2   : > { %s2088_s13 = smov %s1460_s14  ;;  %s2089_s14 = smov %s1526_s21 }
0x35f3   : > { %s2090_s15 = smov %s1514_s18  ;;  %18 = sbr.rel (!%p16_p4) target bundleno = 5 (0x5), region = 77 }
0x35fa   :  { %1247 = vsyncpa [#allocation3], 1 }
0x35fb   :  { %1249 = vsyncpa [#allocation3 + $0x1], 1 }
0x35fc   :  { %1250 = vsyncpa [#allocation4], 1 }
0x35fd   :  { %1252 = vsyncpa [#allocation4 + $0x1], 1 }

</bundles_post_ra>
